<compile_context>
chip_gen: v7x
topology: tpu7x:2x2x1
jax: 0.10.0
libtpu: 0.0.40
codegen_flags: <defaults>
</compile_context>

<pallas_src>
import math
import functools

import jax
import jax.numpy as jnp
from jax import lax
from jax.experimental import pallas as pl
from jax.experimental.pallas import tpu as pltpu


def _hog_kernel(*refs, nbins, pool, cos_tab, sin_tab, row_pool_matmul, scale):
    if row_pool_matmul:
        x_ref, pc_ref, ml_ref, mr_ref, mt_ref, mb_ref, pr_ref, o_ref = refs
    else:
        x_ref, pc_ref, ml_ref, mr_ref, mt_ref, mb_ref, o_ref = refs
        pr_ref = None

    f32 = jnp.float32
    x = x_ref[0]                               # (Hs, Ws): Bh x Bw packed images
    hs, ws = x.shape

    ml = ml_ref[...]                           # (1, Ws)  left-neighbour exists
    mr = mr_ref[...]                           # (1, Ws)  right-neighbour exists
    mt = mt_ref[...]                           # (Hs, 1)  top-neighbour exists
    mb = mb_ref[...]                           # (Hs, 1)  bottom-neighbour exists

    # --- separable 3x3 Sobel pair with per-image zero halos ------------------
    # weight[0] = [[1,0,-1],[2,0,-2],[1,0,-1]], weight[1] = weight[0].T
    # Shifted taps come from jnp.roll (one concat-of-slices pass each); taps
    # that would wrap around or cross a packed-image boundary are zeroed by the
    # masks, reproducing F.conv2d(..., padding=1) for every packed image.
    left = jnp.roll(x, 1, axis=1) * ml         # x[y, j-1]
    right = jnp.roll(x, -1, axis=1) * mr       # x[y, j+1]
    d = left - right                           # horizontal difference
    s = left + 2.0 * x + right                 # horizontal smoothing
    gx = jnp.roll(d, 1, axis=0) * mt + 2.0 * d + jnp.roll(d, -1, axis=0) * mb
    gy = jnp.roll(s, 1, axis=0) * mt - jnp.roll(s, -1, axis=0) * mb

    mag = jnp.sqrt(gx * gx + gy * gy)          # == gxy.norm(dim=1)
    omm = 1.0 - mag

    # --- orientation binning (exact, comparison only) -------------------------
    # fb = floor(atan2(gx, gy) / pi * nbins) mod nbins
    #    = #{k in 1..nbins-1 : boundary k*pi/nbins lies at/below the orientation
    #      mod pi}, decided by cross-product sign tests.  Folding sign(gx) into
    #      |gx| / sign-flipped gy removes one multiply per test.
    gx_pos = gx >= 0.0
    gx_zero = gx == 0.0
    ax = jnp.abs(gx)
    ay = jnp.where(gx_pos, gy, -gy)
    fb = jnp.zeros(x.shape, jnp.int32)
    for k in range(1, nbins):
        fb = fb + (cos_tab[k] * ax - sin_tab[k] * ay >= 0.0).astype(jnp.int32)
    fb = jnp.where(gx_zero, 0, fb)             # atan2(0, .) in {0, pi} -> bin 0
    # ceil == floor only where the angle sits exactly on a bin boundary:
    # gx == 0 always; gy == 0 only when nbins is even (q = +/- nbins/2).
    if nbins % 2 == 0:
        exact = jnp.logical_or(gx_zero, gy == 0.0)
    else:
        exact = gx_zero
    t = exact.astype(f32) * omm
    m_floor = mag + t                          # scatter_(fb, mag) (+ tied ceil)
    o_next = omm - t                           # scatter_add_(fb+1 mod nbins, 1-mag)

    # --- per-bin soft scatter + AvgPool2d(pool, stride=pool) ------------------
    # Rows are pooled with an exact sublane reshape+sum (no block-diagonal
    # matmul); columns with a small 0/1 (or 1/pool^2) matrix on the MXU.
    # TODO(synk): for very large tiles, wrap this loop in a row-chunked
    #             lax.fori_loop accumulating pooled partials into VMEM scratch
    #             so the per-bin temporaries stay vreg-resident.
    pc = pc_ref[...]                           # (Ws, Bw*wp)
    pr = pr_ref[...] if row_pool_matmul else None  # (Bh*hp, Hs) fallback only
    prev = fb == (nbins - 1)
    pooled = []
    for b in range(nbins):
        cur = fb == b
        hist = jnp.where(cur, m_floor, 0.0) + jnp.where(prev, o_next, 0.0)
        if row_pool_matmul:                    # h % pool != 0 fallback
            rows = jnp.dot(pr, hist, precision=lax.Precision.HIGHEST,
                           preferred_element_type=f32)
        else:                                  # exact sublane pool, no matmul
            rows = hist.reshape(hs // pool, pool, ws).sum(axis=1)
        pooled.append(jnp.dot(rows, pc, precision=lax.Precision.HIGHEST,
                              preferred_element_type=f32))
        prev = cur

    out = jnp.concatenate(pooled, axis=1)      # (Bh*hp, nbins*Bw*wp) lane dense
    if scale != 1.0:                           # only when pool is not a power of two
        out = out * scale
    o_ref[0] = out


@functools.lru_cache(maxsize=None)
def _vmem_limits():
    """(per-tile temporary budget, vmem_limit_bytes), sized per TPU generation."""
    try:
        cap = int(pltpu.get_tpu_info().vmem_capacity_bytes)
    except Exception:                          # unknown -> assume smallest (v7x, 64 MiB)
        cap = 64 << 20
    limit = int(min(max(cap - (16 << 20), 32 << 20), 96 << 20))
    return limit // 3, limit


def _pick_packing(n, h, w, budget_bytes):
    """Images packed per tile: (bh along sublanes, bw along lanes).

    The kernel is VALU bound, so first widen the lane axis toward 128-512
    lanes (every vector op spans 128 lanes regardless of W), then stack
    images along sublanes to amortise the ~0.35us per-grid-step overhead,
    keeping ~80 B/pixel of live temporaries inside the VMEM budget.  Grid
    steps stay independent ("parallel"), so large n still spreads across
    both TensorCores on multi-TC parts.
    """
    bytes_per_pixel = 80
    max_pixels = max(h * w, budget_bytes // bytes_per_pixel)
    bw = 1
    while bw < n and (bw + 1) * w <= 512 and h * (bw + 1) * w <= max_pixels:
        bw += 1
    bh = 1
    rem = -(-n // bw)
    while bh < rem and (bh + 1) * h <= 512 and (bh + 1) * h * bw * w <= max_pixels:
        bh += 1
    return bh, bw


@functools.partial(jax.jit, static_argnames=("nbins", "pool", "max_angle"))
def hog_layer(x, nbins=10, pool=8, max_angle=math.pi):
    """Pallas HOGLayer forward. x: (N, 1, H, W) or (N, H, W) float32 (NCHW)."""
    # TODO(synk): the comparison-based binning assumes max_angle == math.pi (the
    #             module default); a general max_angle needs an in-kernel atan2.
    assert max_angle == math.pi
    if x.ndim == 3:
        x = x[:, None]
    n, c, h, w = x.shape
    assert c == 1, "HOGLayer weight has a single input channel"
    assert h >= pool and w >= pool
    hp, wp = h // pool, w // pool

    budget, vmem_limit = _vmem_limits()
    bh, bw = _pick_packing(n, h, w, budget)
    hs, ws = bh * h, bw * w
    rh, cw = bh * hp, bw * wp
    tiles = -(-n // (bh * bw))
    n_pad = tiles * bh * bw

    # TODO(synk): a single image whose ~80 B/pixel of temporaries exceed the
    #             VMEM budget still needs a row-tiling grid axis with a 1-row
    #             halo; not required for the packed-small-image regime here.

    x2 = x[:, 0].astype(jnp.float32)
    if n_pad != n:
        x2 = jnp.concatenate([x2, jnp.zeros((n_pad - n, h, w), jnp.float32)], 0)
    # pack bh x bw images per (hs, ws) tile: image (r, c) -> rows r*h.., cols c*w..
    x_tiles = (x2.reshape(tiles, bh, bw, h, w)
                 .transpose(0, 1, 3, 2, 4)
                 .reshape(tiles, hs, ws))

    # {0,1} edge masks: zero the Sobel taps that would wrap around or cross a
    # packed-image boundary, reproducing conv2d's padding=1 zero halo.
    col = jnp.arange(ws) % w
    row = jnp.arange(hs) % h
    ml = (col != 0).astype(jnp.float32)[None, :]
    mr = (col != w - 1).astype(jnp.float32)[None, :]
    mt = (row != 0).astype(jnp.float32)[:, None]
    mb = (row != h - 1).astype(jnp.float32)[:, None]

    # column pooler: block-diagonal over the bw lane-packed images; the
    # 1/pool^2 average is folded in when exact in bf16 (pool a power of two).
    j = jnp.arange(ws)
    cidx = jnp.arange(cw)
    pc = ((j[:, None] // w == cidx[None, :] // wp)
          & ((j[:, None] % w) // pool == cidx[None, :] % wp)).astype(jnp.float32)
    if pool & (pool - 1) == 0:
        pc = pc * (1.0 / float(pool * pool))
        scale = 1.0
    else:
        scale = 1.0 / float(pool * pool)

    row_pool_matmul = (h % pool) != 0
    operands = [x_tiles, pc, ml, mr, mt, mb]
    in_specs = [
        pl.BlockSpec((1, hs, ws), lambda i: (i, 0, 0)),
        pl.BlockSpec((ws, cw), lambda i: (0, 0)),
        pl.BlockSpec((1, ws), lambda i: (0, 0)),
        pl.BlockSpec((1, ws), lambda i: (0, 0)),
        pl.BlockSpec((hs, 1), lambda i: (0, 0)),
        pl.BlockSpec((hs, 1), lambda i: (0, 0)),
    ]
    if row_pool_matmul:
        # fallback row pooler (only when h % pool != 0): small block diagonal
        # over the bh sublane-packed images (bounded by the tile, not by n).
        r = jnp.arange(rh)
        i2 = jnp.arange(hs)
        pr = ((r[:, None] // hp == i2[None, :] // h)
              & (r[:, None] % hp == (i2[None, :] % h) // pool)).astype(jnp.float32)
        operands.append(pr)
        in_specs.append(pl.BlockSpec((rh, hs), lambda i: (0, 0)))

    cos_tab = tuple(float(math.cos(k * math.pi / nbins)) for k in range(nbins))
    sin_tab = tuple(float(math.sin(k * math.pi / nbins)) for k in range(nbins))
    kernel = functools.partial(
        _hog_kernel, nbins=nbins, pool=pool, cos_tab=cos_tab, sin_tab=sin_tab,
        row_pool_matmul=row_pool_matmul, scale=scale)

    out = pl.pallas_call(
        kernel,
        out_shape=jax.ShapeDtypeStruct((tiles, rh, nbins * cw), jnp.float32),
        grid=(tiles,),
        in_specs=in_specs,
        out_specs=pl.BlockSpec((1, rh, nbins * cw), lambda i: (i, 0, 0)),
        compiler_params=pltpu.CompilerParams(
            dimension_semantics=("parallel",),
            vmem_limit_bytes=vmem_limit),
    )(*operands)

    # unscramble the lane-dense per-tile blocks back to NCHW (n, nbins, hp, wp)
    out = out.reshape(tiles, bh, hp, nbins, bw, wp)
    out = out.transpose(0, 1, 4, 3, 2, 5).reshape(n_pad, nbins, hp, wp)
    return out[:n]


def _hog_reference(x, nbins=10, pool=8, max_angle=math.pi):
    """Plain-JAX mirror of the PyTorch module (sanity check)."""
    if x.ndim == 3:
        x = x[:, None]
    n, _, h, w = x.shape
    xp = jnp.pad(x[:, 0].astype(jnp.float32), ((0, 0), (1, 1), (1, 1)))
    tl = xp[:, 0:h, 0:w];       tc = xp[:, 0:h, 1:w + 1];       tr = xp[:, 0:h, 2:w + 2]
    ml = xp[:, 1:h + 1, 0:w];                                   mr = xp[:, 1:h + 1, 2:w + 2]
    bl = xp[:, 2:h + 2, 0:w];   bc = xp[:, 2:h + 2, 1:w + 1];   br = xp[:, 2:h + 2, 2:w + 2]
    gx = (tl - tr) + 2.0 * (ml - mr) + (bl - br)
    gy = (tl + 2.0 * tc + tr) - (bl + 2.0 * bc + br)
    mag = jnp.sqrt(gx * gx + gy * gy)
    q = jnp.arctan2(gx, gy) / max_angle * nbins
    fb = jnp.remainder(jnp.floor(q).astype(jnp.int32), nbins)
    cb = jnp.remainder(jnp.ceil(q).astype(jnp.int32), nbins)
    bins = jnp.arange(nbins).reshape(1, nbins, 1, 1)
    out = (jnp.where(fb[:, None] == bins, mag[:, None], 0.0)
           + jnp.where(cb[:, None] == bins, 1.0 - mag[:, None], 0.0))
    out = out.reshape(n, nbins, h // pool, pool, w // pool, pool).mean(axis=(3, 5))
    return out


if __name__ == "__main__":
    key = jax.random.PRNGKey(0)
    x = jax.random.normal(key, (2, 1, 16, 16), dtype=jnp.float32)

    out = hog_layer(x, nbins=10, pool=8)
    out = jax.block_until_ready(out)
    assert out.shape == (2, 10, 2, 2), out.shape

    ref = _hog_reference(x, nbins=10, pool=8)
    err = float(jnp.max(jnp.abs(out - ref)))
    # 1e-3 covers f32 association differences in the separable Sobel / pooling
    # and (measure-zero) one-bin ties exactly on a sector boundary.
    if err > 1e-3:
        raise AssertionError(f"Pallas HOG mismatch vs reference, max abs err = {err}")
    print("KERNEL_OK")
</pallas_src>

<mosaic_0001>
module attributes {stable_mosaic.version = 11 : i64} {
  func.func @_hog_kernel(%arg0: i32, %arg1: memref<1x16x32xf32, #tpu.memory_space<vmem>>, %arg2: memref<32x4xf32, #tpu.memory_space<vmem>>, %arg3: memref<1x32xf32, #tpu.memory_space<vmem>>, %arg4: memref<1x32xf32, #tpu.memory_space<vmem>>, %arg5: memref<16x1xf32, #tpu.memory_space<vmem>>, %arg6: memref<16x1xf32, #tpu.memory_space<vmem>>, %arg7: memref<1x2x40xf32, #tpu.memory_space<vmem>>) attributes {dimension_semantics = [#tpu.dimension_semantics<parallel>], iteration_bounds = array<i64: 1>, scalar_prefetch = 0 : i64, scratch_operands = 0 : i64, tpu.core_type = #tpu.core_type<tc>, window_params = [{transform_indices = @transform_0, window_bounds = array<i64: 1, 16, 32>}, {pipeline_mode = #tpu.pipeline_mode<synchronous>, transform_indices = @transform_1, window_bounds = array<i64: 32, 4>}, {pipeline_mode = #tpu.pipeline_mode<synchronous>, transform_indices = @transform_2, window_bounds = array<i64: 1, 32>}, {pipeline_mode = #tpu.pipeline_mode<synchronous>, transform_indices = @transform_3, window_bounds = array<i64: 1, 32>}, {pipeline_mode = #tpu.pipeline_mode<synchronous>, transform_indices = @transform_4, window_bounds = array<i64: 16, 1>}, {pipeline_mode = #tpu.pipeline_mode<synchronous>, transform_indices = @transform_5, window_bounds = array<i64: 16, 1>}, {transform_indices = @transform_6, window_bounds = array<i64: 1, 2, 40>}]} {
    %c0 = arith.constant 0 : index
    %c0_0 = arith.constant 0 : index
    %c0_1 = arith.constant 0 : index
    %0 = vector.load %arg1[%c0, %c0_0, %c0_1] : memref<1x16x32xf32, #tpu.memory_space<vmem>>, vector<1x16x32xf32>
    %1 = vector.shape_cast %0 : vector<1x16x32xf32> to vector<16x32xf32>
    %c0_2 = arith.constant 0 : index
    %c0_3 = arith.constant 0 : index
    %2 = vector.load %arg3[%c0_2, %c0_3] : memref<1x32xf32, #tpu.memory_space<vmem>>, vector<1x32xf32>
    %c0_4 = arith.constant 0 : index
    %c0_5 = arith.constant 0 : index
    %3 = vector.load %arg4[%c0_4, %c0_5] : memref<1x32xf32, #tpu.memory_space<vmem>>, vector<1x32xf32>
    %c0_6 = arith.constant 0 : index
    %c0_7 = arith.constant 0 : index
    %4 = vector.load %arg5[%c0_6, %c0_7] : memref<16x1xf32, #tpu.memory_space<vmem>>, vector<16x1xf32>
    %c0_8 = arith.constant 0 : index
    %c0_9 = arith.constant 0 : index
    %5 = vector.load %arg6[%c0_8, %c0_9] : memref<16x1xf32, #tpu.memory_space<vmem>>, vector<16x1xf32>
    %6 = vector.extract_strided_slice %1 {offsets = [0, 31], sizes = [16, 1], strides = [1, 1]} : vector<16x32xf32> to vector<16x1xf32>
    %7 = vector.extract_strided_slice %1 {offsets = [0, 0], sizes = [16, 31], strides = [1, 1]} : vector<16x32xf32> to vector<16x31xf32>
    %8 = tpu.concatenate %6, %7 in 1 : vector<16x1xf32>, vector<16x31xf32> -> vector<16x32xf32>
    %9 = vector.broadcast %2 : vector<1x32xf32> to vector<16x32xf32>
    %10 = arith.mulf %8, %9 : vector<16x32xf32>
    %11 = vector.extract_strided_slice %1 {offsets = [0, 1], sizes = [16, 31], strides = [1, 1]} : vector<16x32xf32> to vector<16x31xf32>
    %12 = vector.extract_strided_slice %1 {offsets = [0, 0], sizes = [16, 1], strides = [1, 1]} : vector<16x32xf32> to vector<16x1xf32>
    %13 = tpu.concatenate %11, %12 in 1 : vector<16x31xf32>, vector<16x1xf32> -> vector<16x32xf32>
    %14 = vector.broadcast %3 : vector<1x32xf32> to vector<16x32xf32>
    %15 = arith.mulf %13, %14 : vector<16x32xf32>
    %16 = arith.subf %10, %15 : vector<16x32xf32>
    %cst = arith.constant 2.000000e+00 : f32
    %17 = vector.broadcast %cst : f32 to vector<16x32xf32>
    %18 = arith.mulf %17, %1 : vector<16x32xf32>
    %19 = arith.addf %10, %18 : vector<16x32xf32>
    %20 = arith.addf %19, %15 : vector<16x32xf32>
    %21 = vector.extract_strided_slice %16 {offsets = [15, 0], sizes = [1, 32], strides = [1, 1]} : vector<16x32xf32> to vector<1x32xf32>
    %22 = vector.extract_strided_slice %16 {offsets = [0, 0], sizes = [15, 32], strides = [1, 1]} : vector<16x32xf32> to vector<15x32xf32>
    %23 = tpu.concatenate %21, %22 in 0 : vector<1x32xf32>, vector<15x32xf32> -> vector<16x32xf32>
    %24 = vector.broadcast %4 : vector<16x1xf32> to vector<16x32xf32>
    %25 = arith.mulf %23, %24 : vector<16x32xf32>
    %cst_10 = arith.constant 2.000000e+00 : f32
    %26 = vector.broadcast %cst_10 : f32 to vector<16x32xf32>
    %27 = arith.mulf %26, %16 : vector<16x32xf32>
    %28 = arith.addf %25, %27 : vector<16x32xf32>
    %29 = vector.extract_strided_slice %16 {offsets = [1, 0], sizes = [15, 32], strides = [1, 1]} : vector<16x32xf32> to vector<15x32xf32>
    %30 = vector.extract_strided_slice %16 {offsets = [0, 0], sizes = [1, 32], strides = [1, 1]} : vector<16x32xf32> to vector<1x32xf32>
    %31 = tpu.concatenate %29, %30 in 0 : vector<15x32xf32>, vector<1x32xf32> -> vector<16x32xf32>
    %32 = vector.broadcast %5 : vector<16x1xf32> to vector<16x32xf32>
    %33 = arith.mulf %31, %32 : vector<16x32xf32>
    %34 = arith.addf %28, %33 : vector<16x32xf32>
    %35 = vector.extract_strided_slice %20 {offsets = [15, 0], sizes = [1, 32], strides = [1, 1]} : vector<16x32xf32> to vector<1x32xf32>
    %36 = vector.extract_strided_slice %20 {offsets = [0, 0], sizes = [15, 32], strides = [1, 1]} : vector<16x32xf32> to vector<15x32xf32>
    %37 = tpu.concatenate %35, %36 in 0 : vector<1x32xf32>, vector<15x32xf32> -> vector<16x32xf32>
    %38 = vector.broadcast %4 : vector<16x1xf32> to vector<16x32xf32>
    %39 = arith.mulf %37, %38 : vector<16x32xf32>
    %40 = vector.extract_strided_slice %20 {offsets = [1, 0], sizes = [15, 32], strides = [1, 1]} : vector<16x32xf32> to vector<15x32xf32>
    %41 = vector.extract_strided_slice %20 {offsets = [0, 0], sizes = [1, 32], strides = [1, 1]} : vector<16x32xf32> to vector<1x32xf32>
    %42 = tpu.concatenate %40, %41 in 0 : vector<15x32xf32>, vector<1x32xf32> -> vector<16x32xf32>
    %43 = vector.broadcast %5 : vector<16x1xf32> to vector<16x32xf32>
    %44 = arith.mulf %42, %43 : vector<16x32xf32>
    %45 = arith.subf %39, %44 : vector<16x32xf32>
    %46 = arith.mulf %34, %34 : vector<16x32xf32>
    %47 = arith.mulf %45, %45 : vector<16x32xf32>
    %48 = arith.addf %46, %47 : vector<16x32xf32>
    %49 = math.sqrt %48 : vector<16x32xf32>
    %cst_11 = arith.constant 1.000000e+00 : f32
    %50 = vector.broadcast %cst_11 : f32 to vector<16x32xf32>
    %51 = arith.subf %50, %49 : vector<16x32xf32>
    %cst_12 = arith.constant 0.000000e+00 : f32
    %52 = vector.broadcast %cst_12 : f32 to vector<16x32xf32>
    %53 = arith.cmpf oge, %34, %52 : vector<16x32xf32>
    %cst_13 = arith.constant 0.000000e+00 : f32
    %54 = vector.broadcast %cst_13 : f32 to vector<16x32xf32>
    %55 = arith.cmpf oeq, %34, %54 : vector<16x32xf32>
    %56 = math.absf %34 : vector<16x32xf32>
    %cst_14 = arith.constant 0.000000e+00 : f32
    %57 = vector.broadcast %cst_14 : f32 to vector<16x32xf32>
    %58 = arith.subf %57, %45 : vector<16x32xf32>
    %59 = arith.select %53, %45, %58 : vector<16x32xi1>, vector<16x32xf32>
    %c0_i32 = arith.constant 0 : i32
    %60 = vector.broadcast %c0_i32 : i32 to vector<16x32xi32>
    %cst_15 = arith.constant 0.95105654 : f32
    %61 = vector.broadcast %cst_15 : f32 to vector<16x32xf32>
    %62 = arith.mulf %61, %56 : vector<16x32xf32>
    %cst_16 = arith.constant 3.090170e-01 : f32
    %63 = vector.broadcast %cst_16 : f32 to vector<16x32xf32>
    %64 = arith.mulf %63, %59 : vector<16x32xf32>
    %65 = arith.subf %62, %64 : vector<16x32xf32>
    %cst_17 = arith.constant 0.000000e+00 : f32
    %66 = vector.broadcast %cst_17 : f32 to vector<16x32xf32>
    %67 = arith.cmpf oge, %65, %66 : vector<16x32xf32>
    %68 = arith.extui %67 : vector<16x32xi1> to vector<16x32xi32>
    %69 = arith.addi %60, %68 : vector<16x32xi32>
    %cst_18 = arith.constant 8.090170e-01 : f32
    %70 = vector.broadcast %cst_18 : f32 to vector<16x32xf32>
    %71 = arith.mulf %70, %56 : vector<16x32xf32>
    %cst_19 = arith.constant 0.587785244 : f32
    %72 = vector.broadcast %cst_19 : f32 to vector<16x32xf32>
    %73 = arith.mulf %72, %59 : vector<16x32xf32>
    %74 = arith.subf %71, %73 : vector<16x32xf32>
    %cst_20 = arith.constant 0.000000e+00 : f32
    %75 = vector.broadcast %cst_20 : f32 to vector<16x32xf32>
    %76 = arith.cmpf oge, %74, %75 : vector<16x32xf32>
    %77 = arith.extui %76 : vector<16x32xi1> to vector<16x32xi32>
    %78 = arith.addi %69, %77 : vector<16x32xi32>
    %cst_21 = arith.constant 0.587785244 : f32
    %79 = vector.broadcast %cst_21 : f32 to vector<16x32xf32>
    %80 = arith.mulf %79, %56 : vector<16x32xf32>
    %cst_22 = arith.constant 8.090170e-01 : f32
    %81 = vector.broadcast %cst_22 : f32 to vector<16x32xf32>
    %82 = arith.mulf %81, %59 : vector<16x32xf32>
    %83 = arith.subf %80, %82 : vector<16x32xf32>
    %cst_23 = arith.constant 0.000000e+00 : f32
    %84 = vector.broadcast %cst_23 : f32 to vector<16x32xf32>
    %85 = arith.cmpf oge, %83, %84 : vector<16x32xf32>
    %86 = arith.extui %85 : vector<16x32xi1> to vector<16x32xi32>
    %87 = arith.addi %78, %86 : vector<16x32xi32>
    %cst_24 = arith.constant 3.090170e-01 : f32
    %88 = vector.broadcast %cst_24 : f32 to vector<16x32xf32>
    %89 = arith.mulf %88, %56 : vector<16x32xf32>
    %cst_25 = arith.constant 0.95105654 : f32
    %90 = vector.broadcast %cst_25 : f32 to vector<16x32xf32>
    %91 = arith.mulf %90, %59 : vector<16x32xf32>
    %92 = arith.subf %89, %91 : vector<16x32xf32>
    %cst_26 = arith.constant 0.000000e+00 : f32
    %93 = vector.broadcast %cst_26 : f32 to vector<16x32xf32>
    %94 = arith.cmpf oge, %92, %93 : vector<16x32xf32>
    %95 = arith.extui %94 : vector<16x32xi1> to vector<16x32xi32>
    %96 = arith.addi %87, %95 : vector<16x32xi32>
    %cst_27 = arith.constant 6.12323426E-17 : f32
    %97 = vector.broadcast %cst_27 : f32 to vector<16x32xf32>
    %98 = arith.mulf %97, %56 : vector<16x32xf32>
    %cst_28 = arith.constant 1.000000e+00 : f32
    %99 = vector.broadcast %cst_28 : f32 to vector<16x32xf32>
    %100 = arith.mulf %99, %59 : vector<16x32xf32>
    %101 = arith.subf %98, %100 : vector<16x32xf32>
    %cst_29 = arith.constant 0.000000e+00 : f32
    %102 = vector.broadcast %cst_29 : f32 to vector<16x32xf32>
    %103 = arith.cmpf oge, %101, %102 : vector<16x32xf32>
    %104 = arith.extui %103 : vector<16x32xi1> to vector<16x32xi32>
    %105 = arith.addi %96, %104 : vector<16x32xi32>
    %cst_30 = arith.constant -3.090170e-01 : f32
    %106 = vector.broadcast %cst_30 : f32 to vector<16x32xf32>
    %107 = arith.mulf %106, %56 : vector<16x32xf32>
    %cst_31 = arith.constant 0.95105654 : f32
    %108 = vector.broadcast %cst_31 : f32 to vector<16x32xf32>
    %109 = arith.mulf %108, %59 : vector<16x32xf32>
    %110 = arith.subf %107, %109 : vector<16x32xf32>
    %cst_32 = arith.constant 0.000000e+00 : f32
    %111 = vector.broadcast %cst_32 : f32 to vector<16x32xf32>
    %112 = arith.cmpf oge, %110, %111 : vector<16x32xf32>
    %113 = arith.extui %112 : vector<16x32xi1> to vector<16x32xi32>
    %114 = arith.addi %105, %113 : vector<16x32xi32>
    %cst_33 = arith.constant -0.587785244 : f32
    %115 = vector.broadcast %cst_33 : f32 to vector<16x32xf32>
    %116 = arith.mulf %115, %56 : vector<16x32xf32>
    %cst_34 = arith.constant 8.090170e-01 : f32
    %117 = vector.broadcast %cst_34 : f32 to vector<16x32xf32>
    %118 = arith.mulf %117, %59 : vector<16x32xf32>
    %119 = arith.subf %116, %118 : vector<16x32xf32>
    %cst_35 = arith.constant 0.000000e+00 : f32
    %120 = vector.broadcast %cst_35 : f32 to vector<16x32xf32>
    %121 = arith.cmpf oge, %119, %120 : vector<16x32xf32>
    %122 = arith.extui %121 : vector<16x32xi1> to vector<16x32xi32>
    %123 = arith.addi %114, %122 : vector<16x32xi32>
    %cst_36 = arith.constant -8.090170e-01 : f32
    %124 = vector.broadcast %cst_36 : f32 to vector<16x32xf32>
    %125 = arith.mulf %124, %56 : vector<16x32xf32>
    %cst_37 = arith.constant 0.587785244 : f32
    %126 = vector.broadcast %cst_37 : f32 to vector<16x32xf32>
    %127 = arith.mulf %126, %59 : vector<16x32xf32>
    %128 = arith.subf %125, %127 : vector<16x32xf32>
    %cst_38 = arith.constant 0.000000e+00 : f32
    %129 = vector.broadcast %cst_38 : f32 to vector<16x32xf32>
    %130 = arith.cmpf oge, %128, %129 : vector<16x32xf32>
    %131 = arith.extui %130 : vector<16x32xi1> to vector<16x32xi32>
    %132 = arith.addi %123, %131 : vector<16x32xi32>
    %cst_39 = arith.constant -0.95105654 : f32
    %133 = vector.broadcast %cst_39 : f32 to vector<16x32xf32>
    %134 = arith.mulf %133, %56 : vector<16x32xf32>
    %cst_40 = arith.constant 3.090170e-01 : f32
    %135 = vector.broadcast %cst_40 : f32 to vector<16x32xf32>
    %136 = arith.mulf %135, %59 : vector<16x32xf32>
    %137 = arith.subf %134, %136 : vector<16x32xf32>
    %cst_41 = arith.constant 0.000000e+00 : f32
    %138 = vector.broadcast %cst_41 : f32 to vector<16x32xf32>
    %139 = arith.cmpf oge, %137, %138 : vector<16x32xf32>
    %140 = arith.extui %139 : vector<16x32xi1> to vector<16x32xi32>
    %141 = arith.addi %132, %140 : vector<16x32xi32>
    %c0_i32_42 = arith.constant 0 : i32
    %142 = vector.broadcast %c0_i32_42 : i32 to vector<16x32xi32>
    %143 = arith.select %55, %142, %141 : vector<16x32xi1>, vector<16x32xi32>
    %cst_43 = arith.constant 0.000000e+00 : f32
    %144 = vector.broadcast %cst_43 : f32 to vector<16x32xf32>
    %145 = arith.cmpf oeq, %45, %144 : vector<16x32xf32>
    %146 = arith.ori %55, %145 : vector<16x32xi1>
    %147 = arith.extui %146 : vector<16x32xi1> to vector<16x32xi32>
    %148 = arith.sitofp %147 : vector<16x32xi32> to vector<16x32xf32>
    %149 = arith.mulf %148, %51 : vector<16x32xf32>
    %150 = arith.addf %49, %149 : vector<16x32xf32>
    %151 = arith.subf %51, %149 : vector<16x32xf32>
    %c0_44 = arith.constant 0 : index
    %c0_45 = arith.constant 0 : index
    %152 = vector.load %arg2[%c0_44, %c0_45] : memref<32x4xf32, #tpu.memory_space<vmem>>, vector<32x4xf32>
    %c9_i32 = arith.constant 9 : i32
    %153 = vector.broadcast %c9_i32 : i32 to vector<16x32xi32>
    %154 = arith.cmpi eq, %143, %153 : vector<16x32xi32>
    %c0_i32_46 = arith.constant 0 : i32
    %155 = vector.broadcast %c0_i32_46 : i32 to vector<16x32xi32>
    %156 = arith.cmpi eq, %143, %155 : vector<16x32xi32>
    %cst_47 = arith.constant 0.000000e+00 : f32
    %157 = vector.broadcast %cst_47 : f32 to vector<16x32xf32>
    %158 = arith.select %156, %150, %157 : vector<16x32xi1>, vector<16x32xf32>
    %cst_48 = arith.constant 0.000000e+00 : f32
    %159 = vector.broadcast %cst_48 : f32 to vector<16x32xf32>
    %160 = arith.select %154, %151, %159 : vector<16x32xi1>, vector<16x32xf32>
    %161 = arith.addf %158, %160 : vector<16x32xf32>
    %162 = vector.shape_cast %161 : vector<16x32xf32> to vector<2x8x32xf32>
    %cst_49 = arith.constant dense<0.000000e+00> : vector<2x32xf32>
    %163 = vector.multi_reduction <add>, %162, %cst_49 [1] : vector<2x8x32xf32> to vector<2x32xf32>
    %cst_50 = arith.constant dense<0.000000e+00> : vector<2x4xf32>
    %164 = tpu.matmul %163, %152, %cst_50 {dimension_numbers = #tpu.dot_dimension_numbers<[1], [0], [0], [1], [0, 0, 1, 1], [], []>, precision = #tpu.contract_precision<fp32>} : vector<2x32xf32>, vector<32x4xf32>, vector<2x4xf32> -> vector<2x4xf32>
    %c1_i32 = arith.constant 1 : i32
    %165 = vector.broadcast %c1_i32 : i32 to vector<16x32xi32>
    %166 = arith.cmpi eq, %143, %165 : vector<16x32xi32>
    %cst_51 = arith.constant 0.000000e+00 : f32
    %167 = vector.broadcast %cst_51 : f32 to vector<16x32xf32>
    %168 = arith.select %166, %150, %167 : vector<16x32xi1>, vector<16x32xf32>
    %cst_52 = arith.constant 0.000000e+00 : f32
    %169 = vector.broadcast %cst_52 : f32 to vector<16x32xf32>
    %170 = arith.select %156, %151, %169 : vector<16x32xi1>, vector<16x32xf32>
    %171 = arith.addf %168, %170 : vector<16x32xf32>
    %172 = vector.shape_cast %171 : vector<16x32xf32> to vector<2x8x32xf32>
    %cst_53 = arith.constant dense<0.000000e+00> : vector<2x32xf32>
    %173 = vector.multi_reduction <add>, %172, %cst_53 [1] : vector<2x8x32xf32> to vector<2x32xf32>
    %cst_54 = arith.constant dense<0.000000e+00> : vector<2x4xf32>
    %174 = tpu.matmul %173, %152, %cst_54 {dimension_numbers = #tpu.dot_dimension_numbers<[1], [0], [0], [1], [0, 0, 1, 1], [], []>, precision = #tpu.contract_precision<fp32>} : vector<2x32xf32>, vector<32x4xf32>, vector<2x4xf32> -> vector<2x4xf32>
    %c2_i32 = arith.constant 2 : i32
    %175 = vector.broadcast %c2_i32 : i32 to vector<16x32xi32>
    %176 = arith.cmpi eq, %143, %175 : vector<16x32xi32>
    %cst_55 = arith.constant 0.000000e+00 : f32
    %177 = vector.broadcast %cst_55 : f32 to vector<16x32xf32>
    %178 = arith.select %176, %150, %177 : vector<16x32xi1>, vector<16x32xf32>
    %cst_56 = arith.constant 0.000000e+00 : f32
    %179 = vector.broadcast %cst_56 : f32 to vector<16x32xf32>
    %180 = arith.select %166, %151, %179 : vector<16x32xi1>, vector<16x32xf32>
    %181 = arith.addf %178, %180 : vector<16x32xf32>
    %182 = vector.shape_cast %181 : vector<16x32xf32> to vector<2x8x32xf32>
    %cst_57 = arith.constant dense<0.000000e+00> : vector<2x32xf32>
    %183 = vector.multi_reduction <add>, %182, %cst_57 [1] : vector<2x8x32xf32> to vector<2x32xf32>
    %cst_58 = arith.constant dense<0.000000e+00> : vector<2x4xf32>
    %184 = tpu.matmul %183, %152, %cst_58 {dimension_numbers = #tpu.dot_dimension_numbers<[1], [0], [0], [1], [0, 0, 1, 1], [], []>, precision = #tpu.contract_precision<fp32>} : vector<2x32xf32>, vector<32x4xf32>, vector<2x4xf32> -> vector<2x4xf32>
    %c3_i32 = arith.constant 3 : i32
    %185 = vector.broadcast %c3_i32 : i32 to vector<16x32xi32>
    %186 = arith.cmpi eq, %143, %185 : vector<16x32xi32>
    %cst_59 = arith.constant 0.000000e+00 : f32
    %187 = vector.broadcast %cst_59 : f32 to vector<16x32xf32>
    %188 = arith.select %186, %150, %187 : vector<16x32xi1>, vector<16x32xf32>
    %cst_60 = arith.constant 0.000000e+00 : f32
    %189 = vector.broadcast %cst_60 : f32 to vector<16x32xf32>
    %190 = arith.select %176, %151, %189 : vector<16x32xi1>, vector<16x32xf32>
    %191 = arith.addf %188, %190 : vector<16x32xf32>
    %192 = vector.shape_cast %191 : vector<16x32xf32> to vector<2x8x32xf32>
    %cst_61 = arith.constant dense<0.000000e+00> : vector<2x32xf32>
    %193 = vector.multi_reduction <add>, %192, %cst_61 [1] : vector<2x8x32xf32> to vector<2x32xf32>
    %cst_62 = arith.constant dense<0.000000e+00> : vector<2x4xf32>
    %194 = tpu.matmul %193, %152, %cst_62 {dimension_numbers = #tpu.dot_dimension_numbers<[1], [0], [0], [1], [0, 0, 1, 1], [], []>, precision = #tpu.contract_precision<fp32>} : vector<2x32xf32>, vector<32x4xf32>, vector<2x4xf32> -> vector<2x4xf32>
    %c4_i32 = arith.constant 4 : i32
    %195 = vector.broadcast %c4_i32 : i32 to vector<16x32xi32>
    %196 = arith.cmpi eq, %143, %195 : vector<16x32xi32>
    %cst_63 = arith.constant 0.000000e+00 : f32
    %197 = vector.broadcast %cst_63 : f32 to vector<16x32xf32>
    %198 = arith.select %196, %150, %197 : vector<16x32xi1>, vector<16x32xf32>
    %cst_64 = arith.constant 0.000000e+00 : f32
    %199 = vector.broadcast %cst_64 : f32 to vector<16x32xf32>
    %200 = arith.select %186, %151, %199 : vector<16x32xi1>, vector<16x32xf32>
    %201 = arith.addf %198, %200 : vector<16x32xf32>
    %202 = vector.shape_cast %201 : vector<16x32xf32> to vector<2x8x32xf32>
    %cst_65 = arith.constant dense<0.000000e+00> : vector<2x32xf32>
    %203 = vector.multi_reduction <add>, %202, %cst_65 [1] : vector<2x8x32xf32> to vector<2x32xf32>
    %cst_66 = arith.constant dense<0.000000e+00> : vector<2x4xf32>
    %204 = tpu.matmul %203, %152, %cst_66 {dimension_numbers = #tpu.dot_dimension_numbers<[1], [0], [0], [1], [0, 0, 1, 1], [], []>, precision = #tpu.contract_precision<fp32>} : vector<2x32xf32>, vector<32x4xf32>, vector<2x4xf32> -> vector<2x4xf32>
    %c5_i32 = arith.constant 5 : i32
    %205 = vector.broadcast %c5_i32 : i32 to vector<16x32xi32>
    %206 = arith.cmpi eq, %143, %205 : vector<16x32xi32>
    %cst_67 = arith.constant 0.000000e+00 : f32
    %207 = vector.broadcast %cst_67 : f32 to vector<16x32xf32>
    %208 = arith.select %206, %150, %207 : vector<16x32xi1>, vector<16x32xf32>
    %cst_68 = arith.constant 0.000000e+00 : f32
    %209 = vector.broadcast %cst_68 : f32 to vector<16x32xf32>
    %210 = arith.select %196, %151, %209 : vector<16x32xi1>, vector<16x32xf32>
    %211 = arith.addf %208, %210 : vector<16x32xf32>
    %212 = vector.shape_cast %211 : vector<16x32xf32> to vector<2x8x32xf32>
    %cst_69 = arith.constant dense<0.000000e+00> : vector<2x32xf32>
    %213 = vector.multi_reduction <add>, %212, %cst_69 [1] : vector<2x8x32xf32> to vector<2x32xf32>
    %cst_70 = arith.constant dense<0.000000e+00> : vector<2x4xf32>
    %214 = tpu.matmul %213, %152, %cst_70 {dimension_numbers = #tpu.dot_dimension_numbers<[1], [0], [0], [1], [0, 0, 1, 1], [], []>, precision = #tpu.contract_precision<fp32>} : vector<2x32xf32>, vector<32x4xf32>, vector<2x4xf32> -> vector<2x4xf32>
    %c6_i32 = arith.constant 6 : i32
    %215 = vector.broadcast %c6_i32 : i32 to vector<16x32xi32>
    %216 = arith.cmpi eq, %143, %215 : vector<16x32xi32>
    %cst_71 = arith.constant 0.000000e+00 : f32
    %217 = vector.broadcast %cst_71 : f32 to vector<16x32xf32>
    %218 = arith.select %216, %150, %217 : vector<16x32xi1>, vector<16x32xf32>
    %cst_72 = arith.constant 0.000000e+00 : f32
    %219 = vector.broadcast %cst_72 : f32 to vector<16x32xf32>
    %220 = arith.select %206, %151, %219 : vector<16x32xi1>, vector<16x32xf32>
    %221 = arith.addf %218, %220 : vector<16x32xf32>
    %222 = vector.shape_cast %221 : vector<16x32xf32> to vector<2x8x32xf32>
    %cst_73 = arith.constant dense<0.000000e+00> : vector<2x32xf32>
    %223 = vector.multi_reduction <add>, %222, %cst_73 [1] : vector<2x8x32xf32> to vector<2x32xf32>
    %cst_74 = arith.constant dense<0.000000e+00> : vector<2x4xf32>
    %224 = tpu.matmul %223, %152, %cst_74 {dimension_numbers = #tpu.dot_dimension_numbers<[1], [0], [0], [1], [0, 0, 1, 1], [], []>, precision = #tpu.contract_precision<fp32>} : vector<2x32xf32>, vector<32x4xf32>, vector<2x4xf32> -> vector<2x4xf32>
    %c7_i32 = arith.constant 7 : i32
    %225 = vector.broadcast %c7_i32 : i32 to vector<16x32xi32>
    %226 = arith.cmpi eq, %143, %225 : vector<16x32xi32>
    %cst_75 = arith.constant 0.000000e+00 : f32
    %227 = vector.broadcast %cst_75 : f32 to vector<16x32xf32>
    %228 = arith.select %226, %150, %227 : vector<16x32xi1>, vector<16x32xf32>
    %cst_76 = arith.constant 0.000000e+00 : f32
    %229 = vector.broadcast %cst_76 : f32 to vector<16x32xf32>
    %230 = arith.select %216, %151, %229 : vector<16x32xi1>, vector<16x32xf32>
    %231 = arith.addf %228, %230 : vector<16x32xf32>
    %232 = vector.shape_cast %231 : vector<16x32xf32> to vector<2x8x32xf32>
    %cst_77 = arith.constant dense<0.000000e+00> : vector<2x32xf32>
    %233 = vector.multi_reduction <add>, %232, %cst_77 [1] : vector<2x8x32xf32> to vector<2x32xf32>
    %cst_78 = arith.constant dense<0.000000e+00> : vector<2x4xf32>
    %234 = tpu.matmul %233, %152, %cst_78 {dimension_numbers = #tpu.dot_dimension_numbers<[1], [0], [0], [1], [0, 0, 1, 1], [], []>, precision = #tpu.contract_precision<fp32>} : vector<2x32xf32>, vector<32x4xf32>, vector<2x4xf32> -> vector<2x4xf32>
    %c8_i32 = arith.constant 8 : i32
    %235 = vector.broadcast %c8_i32 : i32 to vector<16x32xi32>
    %236 = arith.cmpi eq, %143, %235 : vector<16x32xi32>
    %cst_79 = arith.constant 0.000000e+00 : f32
    %237 = vector.broadcast %cst_79 : f32 to vector<16x32xf32>
    %238 = arith.select %236, %150, %237 : vector<16x32xi1>, vector<16x32xf32>
    %cst_80 = arith.constant 0.000000e+00 : f32
    %239 = vector.broadcast %cst_80 : f32 to vector<16x32xf32>
    %240 = arith.select %226, %151, %239 : vector<16x32xi1>, vector<16x32xf32>
    %241 = arith.addf %238, %240 : vector<16x32xf32>
    %242 = vector.shape_cast %241 : vector<16x32xf32> to vector<2x8x32xf32>
    %cst_81 = arith.constant dense<0.000000e+00> : vector<2x32xf32>
    %243 = vector.multi_reduction <add>, %242, %cst_81 [1] : vector<2x8x32xf32> to vector<2x32xf32>
    %cst_82 = arith.constant dense<0.000000e+00> : vector<2x4xf32>
    %244 = tpu.matmul %243, %152, %cst_82 {dimension_numbers = #tpu.dot_dimension_numbers<[1], [0], [0], [1], [0, 0, 1, 1], [], []>, precision = #tpu.contract_precision<fp32>} : vector<2x32xf32>, vector<32x4xf32>, vector<2x4xf32> -> vector<2x4xf32>
    %c9_i32_83 = arith.constant 9 : i32
    %245 = vector.broadcast %c9_i32_83 : i32 to vector<16x32xi32>
    %246 = arith.cmpi eq, %143, %245 : vector<16x32xi32>
    %cst_84 = arith.constant 0.000000e+00 : f32
    %247 = vector.broadcast %cst_84 : f32 to vector<16x32xf32>
    %248 = arith.select %246, %150, %247 : vector<16x32xi1>, vector<16x32xf32>
    %cst_85 = arith.constant 0.000000e+00 : f32
    %249 = vector.broadcast %cst_85 : f32 to vector<16x32xf32>
    %250 = arith.select %236, %151, %249 : vector<16x32xi1>, vector<16x32xf32>
    %251 = arith.addf %248, %250 : vector<16x32xf32>
    %252 = vector.shape_cast %251 : vector<16x32xf32> to vector<2x8x32xf32>
    %cst_86 = arith.constant dense<0.000000e+00> : vector<2x32xf32>
    %253 = vector.multi_reduction <add>, %252, %cst_86 [1] : vector<2x8x32xf32> to vector<2x32xf32>
    %cst_87 = arith.constant dense<0.000000e+00> : vector<2x4xf32>
    %254 = tpu.matmul %253, %152, %cst_87 {dimension_numbers = #tpu.dot_dimension_numbers<[1], [0], [0], [1], [0, 0, 1, 1], [], []>, precision = #tpu.contract_precision<fp32>} : vector<2x32xf32>, vector<32x4xf32>, vector<2x4xf32> -> vector<2x4xf32>
    %255 = tpu.concatenate %164, %174, %184, %194, %204, %214, %224, %234, %244, %254 in 1 : vector<2x4xf32>, vector<2x4xf32>, vector<2x4xf32>, vector<2x4xf32>, vector<2x4xf32>, vector<2x4xf32>, vector<2x4xf32>, vector<2x4xf32>, vector<2x4xf32>, vector<2x4xf32> -> vector<2x40xf32>
    %c0_88 = arith.constant 0 : index
    %c0_89 = arith.constant 0 : index
    %c0_90 = arith.constant 0 : index
    %256 = vector.load %arg7[%c0_88, %c0_89, %c0_90] : memref<1x2x40xf32, #tpu.memory_space<vmem>>, vector<1x2x40xf32>
    %257 = vector.shape_cast %256 : vector<1x2x40xf32> to vector<2x40xf32>
    %258 = vector.shape_cast %255 : vector<2x40xf32> to vector<1x2x40xf32>
    tpu.vector_store %arg7[%c0_88, %c0_89, %c0_90], %258 {strides = array<i32>} : memref<1x2x40xf32, #tpu.memory_space<vmem>>, vector<1x2x40xf32>,
    return
  }
  func.func @transform_0(%arg0: i32) -> (i32, i32, i32) {
    %c0_i32 = arith.constant 0 : i32
    %c0_i32_0 = arith.constant 0 : i32
    %c0_i32_1 = arith.constant 0 : i32
    return %arg0, %c0_i32, %c0_i32_0 : i32, i32, i32
  }
  func.func @transform_1(%arg0: i32) -> (i32, i32) {
    %c0_i32 = arith.constant 0 : i32
    %c0_i32_0 = arith.constant 0 : i32
    %c0_i32_1 = arith.constant 0 : i32
    return %c0_i32, %c0_i32_0 : i32, i32
  }
  func.func @transform_2(%arg0: i32) -> (i32, i32) {
    %c0_i32 = arith.constant 0 : i32
    %c0_i32_0 = arith.constant 0 : i32
    %c0_i32_1 = arith.constant 0 : i32
    return %c0_i32, %c0_i32_0 : i32, i32
  }
  func.func @transform_3(%arg0: i32) -> (i32, i32) {
    %c0_i32 = arith.constant 0 : i32
    %c0_i32_0 = arith.constant 0 : i32
    %c0_i32_1 = arith.constant 0 : i32
    return %c0_i32, %c0_i32_0 : i32, i32
  }
  func.func @transform_4(%arg0: i32) -> (i32, i32) {
    %c0_i32 = arith.constant 0 : i32
    %c0_i32_0 = arith.constant 0 : i32
    %c0_i32_1 = arith.constant 0 : i32
    return %c0_i32, %c0_i32_0 : i32, i32
  }
  func.func @transform_5(%arg0: i32) -> (i32, i32) {
    %c0_i32 = arith.constant 0 : i32
    %c0_i32_0 = arith.constant 0 : i32
    %c0_i32_1 = arith.constant 0 : i32
    return %c0_i32, %c0_i32_0 : i32, i32
  }
  func.func @transform_6(%arg0: i32) -> (i32, i32, i32) {
    %c0_i32 = arith.constant 0 : i32
    %c0_i32_0 = arith.constant 0 : i32
    %c0_i32_1 = arith.constant 0 : i32
    return %arg0, %c0_i32, %c0_i32_0 : i32, i32, i32
  }
}

</mosaic_0001>

<bundles_post_ra>
// kernel: hog_layer.1
= control target key start
LH: loop header
LB: loop body
LE: loop exit
PB: predicated region body
PF: predicated region fallthrough
CT: control target
= control target key end

     0   :  { %v6933_v1 = vmov 0   ;;  %s6934_s23 = smov 1   ;;  %s6935_s24 = smov 97   ;;  %v6938_v7 = vmov 0.0|0.0   ;;  %vm6939_vm0 = vmmov 0   ;;  %v6940_v15 = vmov 0.0   ;;  %s7808_s0 = inlined_call_operand.vmem [shape: f32[1,16,32], index: 0, kind: input, shape index: {}]   ;;  %s7809_s4 = inlined_call_operand.vmem [shape: f32[16,1], index: 4, kind: input, shape index: {}]   ;;  %s7810_s5 = inlined_call_operand.vmem [shape: f32[16,1], index: 5, kind: input, shape index: {}]   ;;  %s7811_s1 = inlined_call_operand.vmem [shape: f32[32,4], index: 1, kind: input, shape index: {}]   ;;  %s7812_s2 = inlined_call_operand.vmem [shape: f32[1,32], index: 2, kind: input, shape index: {}]   ;;  %s7813_s3 = inlined_call_operand.vmem [shape: f32[1,32], index: 3, kind: input, shape index: {}]   ;;  %s7814_s6 = inlined_call_operand.vmem [shape: f32[1,2,40], index: 6, kind: output, shape index: {}]  }
   0x1   :  { %v6988_v0 = vld [vmem:[%s7808_s0] sm:$0xff]  ;;  %6928 = vset.pattern.permute.xlu1 %v6933_v1  ;;  %6927 = vset.pattern.permute.xlu0 %v6933_v1  ;;  %v6997_v2 = vld [vmem:[%s7808_s0 + $0x8] sm:$0xff]  ;;  %s6936_s27 = smov 127   ;;  %s6937_s28 = smov 31   ;;  %v303_v10 = vld [vmem:[%s7811_s1 + $0x10] sm:$0xff]  ;;  %vm45_vm1 = vcmask 7168  }
   0x2   :  { %39 = vrot.lane.b32.xlu1 %v6988_v0, %s6934_s23  ;;  %33 = vrot.lane.b32.xlu0 %v6988_v0, %s6935_s24  ;;  %v28_v3 = vld [vmem:[%s7809_s4 + $0x8] sm:$0xff]  ;;  %v27_v4 = vld [vmem:[%s7809_s4] sm:$0xff]  ;;  %v343_v14 = vand.u32 4294901760, %v303_v10  ;;  %vm68_vm2 = vcmask 252928   ;;  %v81_v51 = vmul.f32 2.0, %v6988_v0  ;;  %v82_v52 = vmul.f32 2.0, %v6997_v2 }
   0x3   :  { %v29_v5 = vld [vmem:[%s7810_s5] sm:$0xff]  ;;  %v30_v6 = vld [vmem:[%s7810_s5 + $0x8] sm:$0xff]  ;;  %6450 = vmatprep.subr.bf16.mxu0 %v6938_v7  ;;  %6486 = vmatprep.subr.bf16.mxu1 %v6938_v7  ;;  %v304_v13 = vld [vmem:[%s7811_s1 + $0x18] sm:$0xff]  ;;  %vm91_vm3 = vcmask 1040384   ;;  %vm113_vm4 = vcmask 1046528   ;;  %s6943_s21 = smov 12  }
   0x4   :  { %v301_v8 = vld [vmem:[%s7811_s1] sm:$0xff]  ;;  %v302_v9 = vld [vmem:[%s7811_s1 + $0x8] sm:$0xff]  ;;  %5798 = vmatprep.mubr.msk.f32.mxu0 %vm6939_vm0, %v6940_v15  ;;  %5864 = vmatprep.mubr.msk.f32.mxu1 %vm6939_vm0, %v6940_v15  ;;  %v346_v16 = vand.u32 4294901760, %v304_v13  ;;  %v431_v23 = vsub.f32 %v303_v10, %v343_v14  ;;  %s6944_s22 = smov 16   ;;  %s6947_s25 = smov 28  }
   0x5   :  { %v337_v11 = vand.u32 4294901760, %v301_v8  ;;  %v340_v12 = vand.u32 4294901760, %v302_v9  ;;  %v5486_v44 = vld [vmem:[%s7812_s2] ss:$0 sm:$0xff]  ;;  %s6941_s2 = smov 4   ;;  %s6948_s26 = smov 32  }
   0x6   :  { %41 = vrot.lane.b32.xlu1 %v6997_v2, %s6934_s23  ;;  %35 = vrot.lane.b32.xlu0 %v6997_v2, %s6935_s24  ;;  %v7039_v18 = vpack.c.bf16 %v346_v16, %v343_v14  ;;  %v438_v24 = vsub.f32 %v304_v13, %v346_v16  ;;  %v432_v27 = vand.u32 4294901760, %v431_v23  ;;  %v5487_v54 = vld [vmem:[%s7813_s3] ss:$0 sm:$0xff]  ;;  %s6942_s3 = smov 8   ;;  %s6945_s23 = smov 20  }
   0x7   :  { %v7035_v17 = vpack.c.bf16 %v340_v12, %v337_v11  ;;  %v417_v19 = vsub.f32 %v301_v8, %v337_v11  ;;  %v424_v20 = vsub.f32 %v302_v9, %v340_v12  ;;  %s6946_s24 = smov 24  }
   0x8   :  { %v439_v28 = vand.u32 4294901760, %v438_v24  ;;  %v433_v31 = vsub.f32 %v431_v23, %v432_v27  ;;  %v7053_v38 = vpack.c.bf16 %v438_v24, %v431_v23 }
   0x9   :  { %6452 = vmatpush3.bf16.msra.mxu0 %v7035_v17  ;;  %6488 = vmatpush3.bf16.msra.mxu1 %v7035_v17  ;;  %v418_v21 = vand.u32 4294901760, %v417_v19  ;;  %v425_v22 = vand.u32 4294901760, %v424_v20  ;;  %v7049_v34 = vpack.c.bf16 %v424_v20, %v417_v19 }
   0xa   :  { %58 = vrot.lane.b32.xlu1 %v6997_v2, %s6936_s27  ;;  %56 = vrot.lane.b32.xlu0 %v6988_v0, %s6936_s27  ;;  %v440_v32 = vsub.f32 %v438_v24, %v439_v28  ;;  %v434_v35 = vand.u32 4294901760, %v433_v31  ;;  %v7060_v49 = vpack.c.bf16 %v439_v28, %v432_v27  ;;  %s6949_s27 = smov 36  }
   0xb   :  { %6453 = vmatprep.subr.bf16.mxu0 %v6938_v7  ;;  %6489 = vmatprep.subr.bf16.mxu1 %v6938_v7  ;;  %v419_v25 = vsub.f32 %v417_v19, %v418_v21  ;;  %v426_v26 = vsub.f32 %v424_v20, %v425_v22  ;;  %v7055_v43 = vpack.c.bf16 %v425_v22, %v418_v21 }
   0xc   :  { %v441_v36 = vand.u32 4294901760, %v440_v32 }
   0xd   :  { %6455 = vmatpush3.bf16.msra.mxu0 %v7039_v18  ;;  %6491 = vmatpush3.bf16.msra.mxu1 %v7039_v18  ;;  %v420_v29 = vand.u32 4294901760, %v419_v25  ;;  %v427_v30 = vand.u32 4294901760, %v426_v26 }
   0xe   :  { %64 = vrot.lane.b32.xlu1 %v6997_v2, %s6937_s28  ;;  %62 = vrot.lane.b32.xlu0 %v6988_v0, %s6937_s28  ;;  %v7051_v37 = vpack.c.bf16 %v441_v36, %v434_v35 }
   0xf   :  { %6456 = vmatprep.subr.bf16.mxu0 %v6938_v7  ;;  %6492 = vmatprep.subr.bf16.mxu1 %v6938_v7  ;;  %v7047_v33 = vpack.c.bf16 %v427_v30, %v420_v29 }
  0x12   :  { %104 = vperm.xlu1 %6928, %v28_v3   ;;  %99 = vperm.xlu0 %6927, %v27_v4  }
  0x16   :  { %123 = vperm.xlu1 %6928, %v29_v5   ;;  %128 = vperm.xlu0 %6927, %v30_v6  }
  0x74   :  { %v40_v39 = vpop.permute.xlu1 %39  ;;  %v34_v40 = vpop.permute.xlu0 %33 }
  0x75   :  { %v46_v45 = vsel %vm45_vm1, %v34_v40, %v40_v39 }
  0x76   :  { %v54_v50 = vmul.f32 %v5486_v44, %v46_v45 }
  0x78   :  { %v42_v41 = vpop.permute.xlu1 %41  ;;  %v36_v42 = vpop.permute.xlu0 %35  ;;  %v83_v59 = vadd.f32 %v81_v51, %v54_v50 }
  0x79   :  { %v47_v46 = vsel %vm45_vm1, %v36_v42, %v42_v41 }
  0x7a   :  { %v55_v53 = vmul.f32 %v5486_v44, %v47_v46 }
  0x7c   :  { %v59_v47 = vpop.permute.xlu1 %58  ;;  %v57_v48 = vpop.permute.xlu0 %56  ;;  %v84_v60 = vadd.f32 %v82_v52, %v55_v53 }
  0x80   :  { %v65_v55 = vpop.permute.xlu1 %64  ;;  %v63_v56 = vpop.permute.xlu0 %62 }
  0x81   :  { %v70_v57 = vsel %vm68_vm2, %v59_v47, %v65_v55  ;;  %v69_v58 = vsel %vm68_vm2, %v57_v48, %v63_v56 }
  0x82   :  { %v78_v61 = vmul.f32 %v5487_v54, %v70_v57  ;;  %v77_v62 = vmul.f32 %v5487_v54, %v69_v58 }
  0x84   :  { %v86_v63 = vadd.f32 %v84_v60, %v78_v61  ;;  %v85_v3 = vadd.f32 %v83_v59, %v77_v62  ;;  %v80_v9 = vsub.f32 %v55_v53, %v78_v61  ;;  %v79_v10 = vsub.f32 %v54_v50, %v77_v62 }
  0x86   :  { %v136_v0 = vrot.slane %v86_v63, 7  ;;  %v147_v4 = vrot.slane %v86_v63, 1  ;;  %v139_v2 = vrot.slane %v85_v3, 7  ;;  %v146_v5 = vrot.slane %v85_v3, 1 }
  0x87   :  { %v88_v13 = vrot.slane %v80_v9, 7  ;;  %v92_v14 = vrot.slane %v79_v10, 7  ;;  %v114_v16 = vrot.slane %v79_v10, 1  ;;  %v115_v19 = vrot.slane %v80_v9, 1 }
  0x88   :  { %v140_v6 = vsel %vm91_vm3, %v139_v2, %v136_v0  ;;  %v143_v8 = vsel %vm91_vm3, %v136_v0, %v139_v2  ;;  %v148_v11 = vsel %vm113_vm4, %v146_v5, %v147_v4  ;;  %v152_v12 = vsel %vm113_vm4, %v147_v4, %v146_v5 }
  0x89   :  { %v93_v21 = vsel %vm91_vm3, %v92_v14, %v88_v13  ;;  %v96_v22 = vsel %vm91_vm3, %v88_v13, %v92_v14  ;;  %v110_v26 = vmul.f32 2.0, %v80_v9  ;;  %v109_v27 = vmul.f32 2.0, %v79_v10 }
  0x8a   :  { %v116_v28 = vsel %vm113_vm4, %v114_v16, %v115_v19  ;;  %v120_v29 = vsel %vm113_vm4, %v115_v19, %v114_v16 }
  0x91   :  { %v105_v20 = vpop.permute.xlu1 %104  ;;  %v100_v23 = vpop.permute.xlu0 %99 }
  0x92   :  { %v108_v24 = vmul.f32 %v105_v20, %v93_v21  ;;  %v107_v25 = vmul.f32 %v100_v23, %v96_v22  ;;  %v145_v31 = vmul.f32 %v140_v6, %v105_v20  ;;  %v144_v35 = vmul.f32 %v143_v8, %v100_v23 }
  0x94   :  { %v112_v30 = vadd.f32 %v110_v26, %v108_v24  ;;  %v111_v32 = vadd.f32 %v109_v27, %v107_v25 }
  0x95   :  { %v124_v36 = vpop.permute.xlu1 %123  ;;  %v129_v39 = vpop.permute.xlu0 %128 }
  0x96   :  { %v131_v40 = vmul.f32 %v124_v36, %v116_v28  ;;  %v153_v41 = vmul.f32 %v148_v11, %v124_v36  ;;  %v132_v42 = vmul.f32 %v129_v39, %v120_v29  ;;  %v154_v44 = vmul.f32 %v152_v12, %v129_v39 }
  0x98   :  { %v7075_v45 = vadd.f32 %v131_v40, %v111_v32  ;;  %v155_v46 = vsub.f32 %v144_v35, %v153_v41  ;;  %v7077_v47 = vadd.f32 %v132_v42, %v112_v30  ;;  %v7079_v48 = vsub.f32 %v145_v31, %v154_v44 }
  0x9a   :  { %v157_v50 = vmul.f32 %v7075_v45, %v7075_v45  ;;  %v159_v51 = vmul.f32 %v155_v46, %v155_v46  ;;  %vm179_vm5 = vcmp.ge.f32.partialorder %v7075_v45, 0.0  ;;  %v183_v52 = vand.u32 2147483647, %v7075_v45 }
  0x9b   :  { %v185_v53 = vsub.f32 0.0, %v155_v46  ;;  %v158_v55 = vmul.f32 %v7077_v47, %v7077_v47  ;;  %v160_v56 = vmul.f32 %v7079_v48, %v7079_v48  ;;  %vm181_vm6 = vcmp.eq.f32.partialorder %v7075_v45, 0.0 }
  0x9c   :  { %v7085_v54 = vadd.f32 %v159_v51, %v157_v50  ;;  %v189_v58 = vmul.f32 0.95105654, %v183_v52  ;;  %v199_v59 = vmul.f32 0.809017, %v183_v52  ;;  %v211_v60 = vmul.f32 0.58778524, %v183_v52 }
  0x9d   :  { %v187_v57 = vsel %vm179_vm5, %v155_v46, %v185_v53  ;;  %vm287_vm7 = vcmp.eq.f32.partialorder %v155_v46, 0.0  ;;  %v223_v3 = vmul.f32 0.309017, %v183_v52  ;;  %v235_v4 = vmul.f32 6.123234e-17, %v183_v52 }
  0x9e   :  { %6929 = vrsqrt.f32 %v7085_v54  ;;  %v191_v61 = vmul.f32 0.309017, %v187_v57  ;;  %v201_v62 = vmul.f32 0.58778524, %v187_v57  ;;  %v213_v63 = vmul.f32 0.809017, %v187_v57  ;;  %vm289_vm2 = vmor %vm181_vm6, %vm287_vm7 }
  0x9f   :  { %v225_v0 = vmul.f32 0.95105654, %v187_v57  ;;  %v7093_v2 = vadd.f32 %v160_v56, %v158_v55  ;;  %v245_v9 = vmul.f32 -0.309017, %v183_v52  ;;  %vm180_vm8 = vcmp.ge.f32.partialorder %v7077_v47, 0.0 }
  0xa0   :  { %v193_v5 = vsub.f32 %v189_v58, %v191_v61  ;;  %v203_v6 = vsub.f32 %v199_v59, %v201_v62  ;;  %v215_v8 = vsub.f32 %v211_v60, %v213_v63  ;;  %v237_v11 = vsub.f32 %v235_v4, %v187_v57 }
  0xa1   :  { %v227_v10 = vsub.f32 %v223_v3, %v225_v0  ;;  %v255_v12 = vmul.f32 -0.58778524, %v183_v52  ;;  %v265_v13 = vmul.f32 -0.809017, %v183_v52  ;;  %v247_v14 = vsub.f32 %v245_v9, %v225_v0 }
  0xa2   :  { %vm195_vm9 = vcmp.ge.f32.partialorder %v193_v5, 0.0  ;;  %vm205_vm10 = vcmp.ge.f32.partialorder %v203_v6, 0.0  ;;  %vm217_vm11 = vcmp.ge.f32.partialorder %v215_v8, 0.0  ;;  %vm165_vm12 = vcmp.eq.f32.partialorder %v7085_v54, inf }
  0xa3   :  { %v197_v16 = vsel %vm195_vm9, 1, %v6933_v1  ;;  %v207_v19 = vsel %vm205_vm10, 1, %v6933_v1  ;;  %vm229_vm13 = vcmp.ge.f32.partialorder %v227_v10, 0.0  ;;  %vm167_vm14 = vcmp.eq.f32.partialorder %v7085_v54, 0.0 }
  0xa4   :  { %v209_v20 = vadd.s32 %v207_v19, %v197_v16  ;;  %vm239_vm15 = vcmp.ge.f32.partialorder %v237_v11, 0.0  ;;  %vm249_vm1 = vcmp.ge.f32.partialorder %v247_v14, 0.0  ;;  %v168_v21 = vand.u32 2147483648, %v7085_v54 }
  0xa5   :  { %v219_v22 = vsel %vm217_vm11, 1, %v6933_v1  ;;  %v257_v23 = vsub.f32 %v255_v12, %v213_v63  ;;  %v267_v24 = vsub.f32 %v265_v13, %v201_v62  ;;  %v231_v26 = vsel %vm229_vm13, 1, %v6933_v1 }
  0xa6   :  { %v221_v25 = vadd.s32 %v219_v22, %v209_v20  ;;  %v275_v27 = vmul.f32 -0.95105654, %v183_v52  ;;  %6931 = vrsqrt.f32 %v7093_v2  ;;  %v241_v29 = vsel %vm239_vm15, 1, %v6933_v1 }
  0xa7   :  { %v251_v30 = vsel %vm249_vm1, 1, %v6933_v1  ;;  %vm259_vm3 = vcmp.ge.f32.partialorder %v257_v23, 0.0  ;;  %vm269_vm4 = vcmp.ge.f32.partialorder %v267_v24, 0.0  ;;  %v5488_v36 = vsel %vm289_vm2, 1.0, %v6940_v15 }
  0xa8   :  { %v6930_v28 = vpop.eup %6929  ;;  %v233_v32 = vadd.s32 %v231_v26, %v221_v25  ;;  %v261_v35 = vsel %vm259_vm3, 1, %v6933_v1  ;;  %v271_v39 = vsel %vm269_vm4, 1, %v6933_v1  ;;  %v277_v40 = vsub.f32 %v275_v27, %v191_v61 }
  0xa9   :  { %v164_v31 = vmul.f32 %v6930_v28, %v7085_v54  ;;  %vm182_vm5 = vcmp.eq.f32.partialorder %v7077_v47, 0.0  ;;  %v184_v41 = vand.u32 2147483647, %v7077_v47  ;;  %v186_v42 = vsub.f32 0.0, %v7079_v48 }
  0xaa   :  { %v243_v46 = vadd.s32 %v241_v29, %v233_v32  ;;  %vm172_vm7 = vcmp.eq.f32.partialorder %v7093_v2, inf  ;;  %v175_v50 = vand.u32 2147483648, %v7093_v2  ;;  %vm288_vm9 = vcmp.eq.f32.partialorder %v7079_v48, 0.0 }
  0xab   :  { %v166_v44 = vsel %vm165_vm12, %v7085_v54, %v164_v31  ;;  %vm279_vm10 = vcmp.ge.f32.partialorder %v277_v40, 0.0  ;;  %vm174_vm11 = vcmp.eq.f32.partialorder %v7093_v2, 0.0  ;;  %v188_v52 = vsel %vm180_vm8, %v7079_v48, %v186_v42  ;;  %vm290_vm15 = vmor %vm182_vm5, %vm288_vm9 }
  0xac   :  { %v169_v51 = vsel %vm167_vm14, %v168_v21, %v166_v44  ;;  %v190_v53 = vmul.f32 0.95105654, %v184_v41  ;;  %v253_v56 = vadd.s32 %v251_v30, %v243_v46  ;;  %v281_v57 = vsel %vm279_vm10, 1, %v6933_v1 }
  0xad   :  { %v177_v55 = vsub.f32 1.0, %v169_v51  ;;  %v192_v58 = vmul.f32 0.309017, %v188_v52  ;;  %v200_v59 = vmul.f32 0.809017, %v184_v41  ;;  %vm315_vm1 = vcmask 261120  }
  0xae   :  { %v202_v60 = vmul.f32 0.58778524, %v188_v52  ;;  %v212_v61 = vmul.f32 0.58778524, %v184_v41  ;;  %v263_v62 = vadd.s32 %v261_v35, %v253_v56  ;;  %v214_v3 = vmul.f32 0.809017, %v188_v52 }
  0xaf   :  { %v295_v63 = vmul.f32 %v5488_v36, %v177_v55  ;;  %v194_v54 = vsub.f32 %v190_v53, %v192_v58  ;;  %v224_v4 = vmul.f32 0.309017, %v184_v41  ;;  %v226_v5 = vmul.f32 0.95105654, %v188_v52 }
  0xb0   :  { %v204_v0 = vsub.f32 %v200_v59, %v202_v60  ;;  %v236_v6 = vmul.f32 6.123234e-17, %v184_v41  ;;  %v6932_v8 = vpop.eup %6931  ;;  %v273_v9 = vadd.s32 %v271_v39, %v263_v62  ;;  %v216_v14 = vsub.f32 %v212_v61, %v214_v3 }
  0xb1   :  { %v7129_v10 = vadd.f32 %v295_v63, %v169_v51  ;;  %v7131_v11 = vsub.f32 %v177_v55, %v295_v63  ;;  %vm196_vm8 = vcmp.ge.f32.partialorder %v194_v54, 0.0  ;;  %v171_v12 = vmul.f32 %v6932_v8, %v7093_v2 }
  0xb2   :  { %v198_v13 = vsel %vm196_vm8, 1, %v6933_v1  ;;  %vm206_vm12 = vcmp.ge.f32.partialorder %v204_v0, 0.0  ;;  %v283_v16 = vadd.s32 %v281_v57, %v273_v9  ;;  %v228_v20 = vsub.f32 %v224_v4, %v226_v5 }
  0xb3   :  { %v208_v19 = vsel %vm206_vm12, 1, %v6933_v1  ;;  %v238_v21 = vsub.f32 %v236_v6, %v188_v52  ;;  %v173_v22 = vsel %vm172_vm7, %v7093_v2, %v171_v12  ;;  %vm218_vm13 = vcmp.ge.f32.partialorder %v216_v14, 0.0 }
  0xb4   :  { %v210_v23 = vadd.s32 %v208_v19, %v198_v13  ;;  %v246_v24 = vmul.f32 -0.309017, %v184_v41  ;;  %v7141_v25 = vsel %vm181_vm6, 0, %v283_v16  ;;  %v176_v26 = vsel %vm174_vm11, %v175_v50, %v173_v22 }
  0xb5   :  { %v220_v27 = vsel %vm218_vm13, 1, %v6933_v1  ;;  %vm230_vm14 = vcmp.ge.f32.partialorder %v228_v20, 0.0  ;;  %v178_v28 = vsub.f32 1.0, %v176_v26  ;;  %vm240_vm2 = vcmp.ge.f32.partialorder %v238_v21, 0.0 }
  0xb6   :  { %v222_v29 = vadd.s32 %v220_v27, %v210_v23  ;;  %v232_v30 = vsel %vm230_vm14, 1, %v6933_v1  ;;  %v242_v45 = vsel %vm240_vm2, 1, %v6933_v1  ;;  %v248_v31 = vsub.f32 %v246_v24, %v226_v5 }
  0xb7   :  { %v256_v32 = vmul.f32 -0.58778524, %v184_v41  ;;  %v266_v2 = vmul.f32 -0.809017, %v184_v41  ;;  %v276_v36 = vmul.f32 -0.95105654, %v184_v41 }
  0xb8   :  { %v234_v35 = vadd.s32 %v232_v30, %v222_v29  ;;  %v5489_v39 = vsel %vm290_vm15, 1.0, %v6940_v15  ;;  %vm305_vm6 = vcmp.eq.s32.totalorder %v7141_v25, 9  ;;  %vm250_vm3 = vcmp.ge.f32.partialorder %v248_v31, 0.0 }
  0xb9   :  { %v258_v48 = vsub.f32 %v256_v32, %v214_v3  ;;  %v268_v40 = vsub.f32 %v266_v2, %v202_v60  ;;  %v296_v42 = vmul.f32 %v5489_v39, %v178_v28  ;;  %v252_v46 = vsel %vm250_vm3, 1, %v6933_v1 }
  0xba   :  { %v244_v44 = vadd.s32 %v242_v45, %v234_v35  ;;  %v278_v50 = vsub.f32 %v276_v36, %v192_v58  ;;  %vm307_vm4 = vcmp.eq.s32.totalorder %v7141_v25, 0  ;;  %v311_v58 = vsel %vm305_vm6, %v7131_v11, 0.0 }
  0xbb   :  { %vm260_vm7 = vcmp.ge.f32.partialorder %v258_v48, 0.0  ;;  %vm270_vm9 = vcmp.ge.f32.partialorder %v268_v40, 0.0  ;;  %v7156_v51 = vadd.f32 %v296_v42, %v176_v26  ;;  %v7158_v52 = vsub.f32 %v178_v28, %v296_v42 }
  0xbc   :  { %v254_v41 = vadd.s32 %v252_v46, %v244_v44  ;;  %v262_v53 = vsel %vm260_vm7, 1, %v6933_v1  ;;  %v272_v55 = vsel %vm270_vm9, 1, %v6933_v1  ;;  %vm280_vm10 = vcmp.ge.f32.partialorder %v278_v50, 0.0 }
  0xbd   :  { %v282_v56 = vsel %vm280_vm10, 1, %v6933_v1  ;;  %v309_v57 = vsel %vm307_vm4, %v7129_v10, 0.0  ;;  %v7172_v59 = vsel %vm305_vm6, %v7129_v10, 0.0  ;;  %vm821_vm11 = vcmp.eq.s32.totalorder %v7141_v25, 1 }
  0xbe   :  { %v264_v60 = vadd.s32 %v262_v53, %v254_v41  ;;  %v313_v61 = vadd.f32 %v311_v58, %v309_v57  ;;  %v825_v1 = vsel %vm307_vm4, %v7131_v11, 0.0  ;;  %v823_v62 = vsel %vm821_vm11, %v7129_v10, 0.0 }
  0xbf   :  { %v1337_v63 = vsel %vm821_vm11, %v7131_v11, 0.0  ;;  %vm1333_vm8 = vcmp.eq.s32.totalorder %v7141_v25, 2  ;;  %vm1845_vm12 = vcmp.eq.s32.totalorder %v7141_v25, 3  ;;  %v827_v0 = vadd.f32 %v825_v1, %v823_v62 }
  0xc0   :  { %v274_v54 = vadd.s32 %v272_v55, %v264_v60  ;;  %v316_v3 = vsel %vm315_vm1, %v313_v61, 0.0  ;;  %v1335_v4 = vsel %vm1333_vm8, %v7129_v10, 0.0  ;;  %v1847_v8 = vsel %vm1845_vm12, %v7129_v10, 0.0 }
  0xc1   :  { %v317_v5 = vrot.slane %v316_v3, 4  ;;  %v1339_v6 = vadd.f32 %v1337_v63, %v1335_v4  ;;  %v1849_v9 = vsel %vm1333_vm8, %v7131_v11, 0.0  ;;  %v829_v13 = vsel %vm315_vm1, %v827_v0, 0.0 }
  0xc2   :  { %v284_v12 = vadd.s32 %v282_v56, %v274_v54  ;;  %v1851_v14 = vadd.f32 %v1849_v9, %v1847_v8  ;;  %vm2357_vm13 = vcmp.eq.s32.totalorder %v7141_v25, 4  ;;  %v830_v19 = vrot.slane %v829_v13, 4 }
  0xc3   :  { %v318_v16 = vadd.f32 %v317_v5, %v316_v3  ;;  %v1341_v20 = vsel %vm315_vm1, %v1339_v6, 0.0  ;;  %v2359_v21 = vsel %vm2357_vm13, %v7129_v10, 0.0  ;;  %v2361_v26 = vsel %vm1845_vm12, %v7131_v11, 0.0 }
  0xc4   :  { %v7196_v22 = vsel %vm182_vm5, 0, %v284_v12  ;;  %v1342_v23 = vrot.slane %v1341_v20, 4  ;;  %v1853_v24 = vsel %vm315_vm1, %v1851_v14, 0.0  ;;  %v831_v2 = vadd.f32 %v830_v19, %v829_v13 }
  0xc5   :  { %vm306_vm14 = vcmp.eq.s32.totalorder %v7196_v22, 9  ;;  %vm308_vm15 = vcmp.eq.s32.totalorder %v7196_v22, 0  ;;  %v319_v27 = vrot.slane %v318_v16, 2  ;;  %vm822_vm2 = vcmp.eq.s32.totalorder %v7196_v22, 1 }
  0xc6   :  { %v310_v28 = vsel %vm308_vm15, %v7156_v51, 0.0  ;;  %v312_v47 = vsel %vm306_vm14, %v7158_v52, 0.0  ;;  %v7208_v29 = vsel %vm306_vm14, %v7156_v51, 0.0  ;;  %v824_v30 = vsel %vm822_vm2, %v7156_v51, 0.0 }
  0xc7   :  { %v314_v45 = vadd.f32 %v312_v47, %v310_v28  ;;  %v320_v31 = vadd.f32 %v319_v27, %v318_v16  ;;  %v826_v32 = vsel %vm308_vm15, %v7158_v52, 0.0  ;;  %v1338_v36 = vsel %vm822_vm2, %v7158_v52, 0.0 }
  0xc8   :  { %v828_v35 = vadd.f32 %v826_v32, %v824_v30  ;;  %vm1334_vm5 = vcmp.eq.s32.totalorder %v7196_v22, 2  ;;  %v1343_v39 = vadd.f32 %v1342_v23, %v1341_v20  ;;  %v832_v42 = vrot.slane %v831_v2, 2 }
  0xc9   :  { %v321_v48 = vrot.slane %v320_v31, 1  ;;  %v323_v40 = vsel %vm315_vm1, %v314_v45, 0.0  ;;  %v1336_v44 = vsel %vm1334_vm5, %v7156_v51, 0.0  ;;  %vm332_vm6 = vcmask 1041409  }
  0xca   :  { %v324_v46 = vrot.slane %v323_v40, 4  ;;  %v836_v50 = vsel %vm315_vm1, %v828_v35, 0.0  ;;  %v1340_v41 = vadd.f32 %v1338_v36, %v1336_v44  ;;  %v1344_v53 = vrot.slane %v1343_v39, 2 }
  0xcb   :  { %v322_v55 = vadd.f32 %v321_v48, %v320_v31  ;;  %v833_v56 = vadd.f32 %v832_v42, %v831_v2  ;;  %v837_v57 = vrot.slane %v836_v50, 4  ;;  %vm1846_vm3 = vcmp.eq.s32.totalorder %v7196_v22, 3 }
  0xcc   :  { %v325_v58 = vadd.f32 %v324_v46, %v323_v40  ;;  %v1345_v60 = vadd.f32 %v1344_v53, %v1343_v39  ;;  %v1348_v61 = vsel %vm315_vm1, %v1340_v41, 0.0  ;;  %v1848_v1 = vsel %vm1846_vm3, %v7156_v51, 0.0 }
  0xcd   :  { %v834_v62 = vrot.slane %v833_v56, 1  ;;  %v838_v63 = vadd.f32 %v837_v57, %v836_v50  ;;  %v1349_v54 = vrot.slane %v1348_v61, 4  ;;  %v1850_v3 = vsel %vm1334_vm5, %v7158_v52, 0.0 }
  0xce   :  { %v326_v0 = vrot.slane %v325_v58, 2  ;;  %v1346_v4 = vrot.slane %v1345_v60, 1  ;;  %v1852_v5 = vadd.f32 %v1850_v3, %v1848_v1  ;;  %v1854_v6 = vrot.slane %v1853_v24, 4 }
  0xcf   :  { %v835_v8 = vadd.f32 %v834_v62, %v833_v56  ;;  %v839_v9 = vrot.slane %v838_v63, 2  ;;  %v1350_v12 = vadd.f32 %v1349_v54, %v1348_v61  ;;  %vm2358_vm4 = vcmp.eq.s32.totalorder %v7196_v22, 4 }
  0xd0   :  { %v327_v13 = vadd.f32 %v326_v0, %v325_v58  ;;  %v1347_v14 = vadd.f32 %v1346_v4, %v1345_v60  ;;  %v1855_v16 = vadd.f32 %v1854_v6, %v1853_v24  ;;  %v1860_v19 = vsel %vm315_vm1, %v1852_v5, 0.0 }
  0xd1   :  { %v840_v20 = vadd.f32 %v839_v9, %v838_v63  ;;  %v1351_v23 = vrot.slane %v1350_v12, 2  ;;  %v1861_v27 = vrot.slane %v1860_v19, 4  ;;  %v2360_v28 = vsel %vm2358_vm4, %v7156_v51, 0.0 }
  0xd2   :  { %v328_v47 = vrot.slane %v327_v13, 1  ;;  %v1856_v30 = vrot.slane %v1855_v16, 2  ;;  %v2362_v45 = vsel %vm1846_vm3, %v7158_v52, 0.0  ;;  %v2363_v31 = vadd.f32 %v2361_v26, %v2359_v21 }
  0xd3   :  { %v841_v32 = vrot.slane %v840_v20, 1  ;;  %v1352_v2 = vadd.f32 %v1351_v23, %v1350_v12  ;;  %v1862_v35 = vadd.f32 %v1861_v27, %v1860_v19  ;;  %v2364_v24 = vadd.f32 %v2362_v45, %v2360_v28 }
  0xd4   :  { %v329_v36 = vadd.f32 %v328_v47, %v327_v13  ;;  %v1857_v39 = vadd.f32 %v1856_v30, %v1855_v16  ;;  %v2365_v48 = vsel %vm315_vm1, %v2363_v31, 0.0  ;;  %vm2869_vm7 = vcmp.eq.s32.totalorder %v7141_v25, 5 }
  0xd5   :  { %v842_v40 = vadd.f32 %v841_v32, %v840_v20  ;;  %v1353_v42 = vrot.slane %v1352_v2, 1  ;;  %v1863_v44 = vrot.slane %v1862_v35, 2  ;;  %v2366_v46 = vrot.slane %v2365_v48, 4 }
  0xd6   :  { %v333_v50 = vsel %vm332_vm6, %v329_v36, %v322_v55  ;;  %v1858_v41 = vrot.slane %v1857_v39, 1  ;;  %v2372_v53 = vsel %vm315_vm1, %v2364_v24, 0.0  ;;  %vm2870_vm9 = vcmp.eq.s32.totalorder %v7196_v22, 5 }
  0xd7   :  { %v334_v21 = vsel %vm315_vm1, %v333_v50, 0  ;;  %v845_v26 = vsel %vm332_vm6, %v842_v40, %v835_v8  ;;  %v1354_v56 = vadd.f32 %v1353_v42, %v1352_v2  ;;  %v1864_v57 = vadd.f32 %v1863_v44, %v1862_v35 }
  0xd8   :  { %v7242_v58 = vand.u32 4294901760, %v334_v21  ;;  %v846_v60 = vsel %vm315_vm1, %v845_v26, 0  ;;  %v1859_v61 = vadd.f32 %v1858_v41, %v1857_v39  ;;  %v2367_v1 = vadd.f32 %v2366_v46, %v2365_v48 }
  0xd9   :  { %v7245_v62 = vand.u32 4294901760, %v846_v60  ;;  %v7248_v55 = vsel %vm332_vm6, %v1354_v56, %v1347_v14  ;;  %v1865_v63 = vrot.slane %v1864_v57, 1  ;;  %v2373_v54 = vrot.slane %v2372_v53, 4 }
  0xda   :  { %v7251_v3 = vsub.f32 %v334_v21, %v7242_v58  ;;  %v2368_v0 = vrot.slane %v2367_v1, 2  ;;  %v2871_v4 = vsel %vm2869_vm7, %v7129_v10, 0.0  ;;  %v2872_v13 = vsel %vm2870_vm9, %v7156_v51, 0.0 }
  0xdb   :  { %v7257_v5 = vsub.f32 %v846_v60, %v7245_v62  ;;  %v1866_v6 = vadd.f32 %v1865_v63, %v1864_v57  ;;  %v2374_v8 = vadd.f32 %v2373_v54, %v2372_v53  ;;  %v2873_v14 = vsel %vm2357_vm13, %v7131_v11, 0.0 }
  0xdc   :  { %v407_v9 = vand.u32 4294901760, %v7251_v3  ;;  %v2369_v12 = vadd.f32 %v2368_v0, %v2367_v1  ;;  %v2874_v28 = vsel %vm2358_vm4, %v7158_v52, 0.0  ;;  %v2875_v31 = vadd.f32 %v2873_v14, %v2871_v4 }
  0xdd   :  { %v919_v16 = vand.u32 4294901760, %v7257_v5  ;;  %v7268_v19 = vsel %vm332_vm6, %v1866_v6, %v1859_v61  ;;  %v2375_v20 = vrot.slane %v2374_v8, 2  ;;  %v2876_v32 = vadd.f32 %v2874_v28, %v2872_v13 }
  0xde   :  { %v408_v23 = vsub.f32 %v7251_v3, %v407_v9  ;;  %v2370_v27 = vrot.slane %v2369_v12, 1  ;;  %v2877_v36 = vsel %vm315_vm1, %v2875_v31, 0.0  ;;  %vm3381_vm10 = vcmp.eq.s32.totalorder %v7141_v25, 6 }
  0xdf   :  { %v920_v47 = vsub.f32 %v7257_v5, %v919_v16  ;;  %v2376_v30 = vadd.f32 %v2375_v20, %v2374_v8  ;;  %v2884_v39 = vsel %vm315_vm1, %v2876_v32, 0.0  ;;  %vm3382_vm11 = vcmp.eq.s32.totalorder %v7196_v22, 6 }
  0xe0   :  { %v409_v45 = vand.u32 4294901760, %v408_v23  ;;  %v2371_v35 = vadd.f32 %v2370_v27, %v2369_v12  ;;  %v2878_v40 = vrot.slane %v2877_v36, 4  ;;  %v2885_v42 = vrot.slane %v2884_v39, 4 }
  0xe1   :  { %v921_v2 = vand.u32 4294901760, %v920_v47  ;;  %v2377_v24 = vrot.slane %v2376_v30, 1  ;;  %v3383_v44 = vsel %vm3381_vm10, %v7129_v10, 0.0  ;;  %v3384_v46 = vsel %vm3382_vm11, %v7156_v51, 0.0 }
  0xe2   :  { %5799 = vmatmul.mubr.f32.vlgmr.msra.gmra.mrb[0].mxu0 %v409_v45  ;;  %v3385_v50 = vsel %vm2869_vm7, %v7131_v11, 0.0  ;;  %v2879_v53 = vadd.f32 %v2878_v40, %v2877_v36  ;;  %v3386_v21 = vsel %vm2870_vm9, %v7158_v52, 0.0  ;;  %v2886_v26 = vadd.f32 %v2885_v42, %v2884_v39 }
  0xe3   :  { %6458 = vmatpush3.bf16.msra.mxu0 %v7047_v33  ;;  %5865 = vmatmul.mubr.f32.vlgmr.msra.gmra.mrb[0].mxu1 %v921_v2  ;;  %v2378_v48 = vadd.f32 %v2377_v24, %v2376_v30  ;;  %v3387_v56 = vadd.f32 %v3385_v50, %v3383_v44  ;;  %v3388_v57 = vadd.f32 %v3386_v21, %v3384_v46  ;;  %vm3893_vm8 = vcmp.eq.s32.totalorder %v7141_v25, 7 }
  0xe4   :  { %6494 = vmatpush3.bf16.msra.mxu1 %v7047_v33  ;;  %6459 = vmatprep.subr.bf16.mxu0 %v6938_v7  ;;  %v2880_v60 = vrot.slane %v2879_v53, 2  ;;  %v2887_v61 = vrot.slane %v2886_v26, 2  ;;  %vm3894_vm12 = vcmp.eq.s32.totalorder %v7196_v22, 7  ;;  %v3895_v8 = vsel %vm3893_vm8, %v7129_v10, 0.0 }
  0xe5   :  { %6495 = vmatprep.subr.bf16.mxu1 %v6938_v7  ;;  %5809 = vmatprep.mubr.msk.f32.mxu0 %vm6939_vm0, %v6940_v15  ;;  %v7299_v41 = vsel %vm332_vm6, %v2378_v48, %v2371_v35  ;;  %v3389_v1 = vsel %vm315_vm1, %v3387_v56, 0.0  ;;  %v3396_v63 = vsel %vm315_vm1, %v3388_v57, 0.0  ;;  %v3896_v12 = vsel %vm3894_vm12, %v7156_v51, 0.0 }
  0xe6   :  { %5875 = vmatprep.mubr.msk.f32.mxu1 %vm6939_vm0, %v6940_v15  ;;  %v2881_v54 = vadd.f32 %v2880_v60, %v2879_v53  ;;  %v3390_v0 = vrot.slane %v3389_v1, 4  ;;  %v3397_v4 = vrot.slane %v3396_v63, 4  ;;  %v2888_v6 = vadd.f32 %v2887_v61, %v2886_v26 }
  0xe7   :  { %6461 = vmatpush3.bf16.msra.mxu0 %v7051_v37  ;;  %v3897_v13 = vsel %vm3381_vm10, %v7131_v11, 0.0  ;;  %v3898_v28 = vsel %vm3382_vm11, %v7158_v52, 0.0  ;;  %vm4405_vm13 = vcmp.eq.s32.totalorder %v7141_v25, 8  ;;  %vm4406_vm14 = vcmp.eq.s32.totalorder %v7196_v22, 8 }
  0xe8   :  { %6497 = vmatpush3.bf16.msra.mxu1 %v7051_v37  ;;  %6462 = vmatprep.subr.bf16.mxu0 %v6938_v7  ;;  %v2882_v14 = vrot.slane %v2881_v54, 1  ;;  %v3391_v20 = vadd.f32 %v3390_v0, %v3389_v1  ;;  %v3398_v23 = vadd.f32 %v3397_v4, %v3396_v63  ;;  %v2889_v27 = vrot.slane %v2888_v6, 1 }
  0xe9   :  { %6498 = vmatprep.subr.bf16.mxu1 %v6938_v7  ;;  %v3899_v47 = vadd.f32 %v3897_v13, %v3895_v8  ;;  %v3900_v2 = vadd.f32 %v3898_v28, %v3896_v12  ;;  %v4407_v42 = vsel %vm4405_vm13, %v7129_v10, 0.0  ;;  %v4408_v44 = vsel %vm4406_vm14, %v7156_v51, 0.0 }
  0xea   :  { %5810 = vmatmul.mubr.f32.vlgmr.msra.gmra.mrb[0].mxu0 %v7242_v58  ;;  %v2883_v30 = vadd.f32 %v2882_v14, %v2881_v54  ;;  %v3392_v45 = vrot.slane %v3391_v20, 2  ;;  %v3399_v31 = vrot.slane %v3398_v23, 2  ;;  %v2890_v32 = vadd.f32 %v2889_v27, %v2888_v6 }
  0xeb   :  { %6464 = vmatpush3.bf16.msra.mxu0 %v7049_v34  ;;  %5876 = vmatmul.mubr.f32.vlgmr.msra.gmra.mrb[0].mxu1 %v7245_v62  ;;  %v3901_v35 = vsel %vm315_vm1, %v3899_v47, 0.0  ;;  %v3908_v40 = vsel %vm315_vm1, %v3900_v2, 0.0  ;;  %v4409_v26 = vsel %vm3893_vm8, %v7131_v11, 0.0  ;;  %v4410_v10 = vsel %vm3894_vm12, %v7158_v52, 0.0 }
  0xec   :  { %6500 = vmatpush3.bf16.msra.mxu1 %v7049_v34  ;;  %6465 = vmatprep.subr.bf16.mxu0 %v6938_v7  ;;  %v3393_v24 = vadd.f32 %v3392_v45, %v3391_v20  ;;  %v3400_v36 = vadd.f32 %v3399_v31, %v3398_v23  ;;  %v3902_v39 = vrot.slane %v3901_v35, 4  ;;  %v7343_v48 = vsel %vm332_vm6, %v2890_v32, %v2883_v30 }
  0xed   :  { %6501 = vmatprep.subr.bf16.mxu1 %v6938_v7  ;;  %5820 = vmatprep.mubr.msk.f32.mxu0 %vm6939_vm0, %v6940_v15  ;;  %v3909_v21 = vrot.slane %v3908_v40, 4  ;;  %v4411_v60 = vadd.f32 %v4409_v26, %v4407_v42  ;;  %v4412_v1 = vadd.f32 %v4410_v10, %v4408_v44  ;;  %v4919_v63 = vsel %vm4405_vm13, %v7131_v11, 0.0 }
  0xee   :  { %5886 = vmatprep.mubr.msk.f32.mxu1 %vm6939_vm0, %v6940_v15  ;;  %v3394_v46 = vrot.slane %v3393_v24, 1  ;;  %v3401_v50 = vrot.slane %v3400_v36, 1  ;;  %v3903_v53 = vadd.f32 %v3902_v39, %v3901_v35  ;;  %v4920_v6 = vsel %vm4406_vm14, %v7158_v52, 0.0 }
  0xef   :  { %6467 = vmatpush3.bf16.msra.mxu0 %v7053_v38  ;;  %v3910_v61 = vadd.f32 %v3909_v21, %v3908_v40  ;;  %v4413_v4 = vsel %vm315_vm1, %v4411_v60, 0.0  ;;  %v4420_v12 = vsel %vm315_vm1, %v4412_v1, 0.0  ;;  %v4921_v13 = vadd.f32 %v4919_v63, %v7172_v59 }
  0xf0   :  { %6503 = vmatpush3.bf16.msra.mxu1 %v7053_v38  ;;  %6468 = vmatprep.subr.bf16.mxu0 %v6938_v7  ;;  %v3395_v51 = vadd.f32 %v3394_v46, %v3393_v24  ;;  %v3402_v56 = vadd.f32 %v3401_v50, %v3400_v36  ;;  %v3904_v57 = vrot.slane %v3903_v53, 2  ;;  %v4414_v11 = vrot.slane %v4413_v4, 4 }
  0xf1   :  { %6504 = vmatprep.subr.bf16.mxu1 %v6938_v7  ;;  %v3911_v25 = vrot.slane %v3910_v61, 2  ;;  %v4421_v22 = vrot.slane %v4420_v12, 4  ;;  %v4922_v52 = vadd.f32 %v4920_v6, %v7208_v29  ;;  %v4923_v23 = vsel %vm315_vm1, %v4921_v13, 0.0 }
  0xf2   :  { %5821 = vmatmul.mubr.f32.vlgmr.msra.gmra.mrb[0].mxu0 %v7251_v3  ;;  %v7371_v54 = vsel %vm332_vm6, %v3402_v56, %v3395_v51  ;;  %v3905_v0 = vadd.f32 %v3904_v57, %v3903_v53  ;;  %v4415_v20 = vadd.f32 %v4414_v11, %v4413_v4  ;;  %v4924_v30 = vrot.slane %v4923_v23, 4 }
  0xf3   :  { %6470 = vmatpush3.bf16.msra.mxu0 %v7035_v17  ;;  %5887 = vmatmul.mubr.f32.vlgmr.msra.gmra.mrb[0].mxu1 %v7257_v5  ;;  %v3912_v14 = vadd.f32 %v3911_v25, %v3910_v61  ;;  %v4422_v59 = vadd.f32 %v4421_v22, %v4420_v12  ;;  %v4930_v45 = vsel %vm315_vm1, %v4922_v52, 0.0  ;;  %v1358_v5 = vsel %vm315_vm1, %v7248_v55, 0 }
  0xf4   :  { %6506 = vmatpush3.bf16.msra.mxu1 %v7035_v17  ;;  %6471 = vmatprep.subr.bf16.mxu0 %v6938_v7  ;;  %v3906_v8 = vrot.slane %v3905_v0, 1  ;;  %v4416_v47 = vrot.slane %v4415_v20, 2  ;;  %v4925_v32 = vadd.f32 %v4924_v30, %v4923_v23  ;;  %v7410_v55 = vand.u32 4294901760, %v1358_v5 }
  0xf5   :  { %6507 = vmatprep.subr.bf16.mxu1 %v6938_v7  ;;  %5831 = vmatprep.mubr.msk.f32.mxu0 %vm6939_vm0, %v6940_v15  ;;  %v3913_v28 = vrot.slane %v3912_v14, 1  ;;  %v4423_v3 = vrot.slane %v4422_v59, 2  ;;  %v2382_v6 = vsel %vm315_vm1, %v7299_v41, 0  ;;  %v2894_v25 = vsel %vm315_vm1, %v7343_v48, 0 }
  0xf6   :  { %5897 = vmatprep.mubr.msk.f32.mxu1 %vm6939_vm0, %v6940_v15  ;;  %v3907_v27 = vadd.f32 %v3906_v8, %v3905_v0  ;;  %v4417_v31 = vadd.f32 %v4416_v47, %v4415_v20  ;;  %v4926_v39 = vrot.slane %v4925_v32, 2  ;;  %v7421_v26 = vsub.f32 %v1358_v5, %v7410_v55 }
  0xf7   :  { %6473 = vmatpush3.bf16.msra.mxu0 %v7039_v18  ;;  %v3914_v29 = vadd.f32 %v3913_v28, %v3912_v14  ;;  %v4424_v24 = vadd.f32 %v4423_v3, %v4422_v59  ;;  %v7514_v11 = vand.u32 4294901760, %v2382_v6  ;;  %v7517_v8 = vand.u32 4294901760, %v2894_v25 }
  0xf8   :  { %6509 = vmatpush3.bf16.msra.mxu1 %v7039_v18  ;;  %6474 = vmatprep.subr.bf16.mxu0 %v6938_v7  ;;  %v4418_v35 = vrot.slane %v4417_v31, 1  ;;  %v4927_v46 = vadd.f32 %v4926_v39, %v4925_v32  ;;  %v1431_v61 = vand.u32 4294901760, %v7421_v26  ;;  %v3406_v23 = vsel %vm315_vm1, %v7371_v54, 0 }
  0xf9   :  { %6510 = vmatprep.subr.bf16.mxu1 %v6938_v7  ;;  %v7405_v2 = vsel %vm332_vm6, %v3914_v29, %v3907_v27  ;;  %v4425_v40 = vrot.slane %v4424_v24, 1  ;;  %v7525_v41 = vsub.f32 %v2382_v6, %v7514_v11  ;;  %v2966_v48 = vsub.f32 %v2894_v25, %v7517_v8 }
  0xfa   :  { %5832 = vmatmul.mubr.f32.vlgmr.msra.gmra.mrb[0].mxu0 %v407_v9  ;;  %v4931_v9 = vrot.slane %v4930_v45, 4  ;;  %v4928_v21 = vrot.slane %v4927_v46, 1  ;;  %v1432_v0 = vsub.f32 %v7421_v26, %v1431_v61  ;;  %v3918_v27 = vsel %vm315_vm1, %v7405_v2, 0 }
  0xfb   :  { %6476 = vmatpush3.bf16.msra.mxu0 %v7055_v43  ;;  %5898 = vmatmul.mubr.f32.vlgmr.msra.gmra.mrb[0].mxu1 %v919_v16  ;;  %v1870_v16 = vsel %vm315_vm1, %v7268_v19, 0  ;;  %v4419_v19 = vadd.f32 %v4418_v35, %v4417_v31  ;;  %v4426_v50 = vadd.f32 %v4425_v40, %v4424_v24  ;;  %v2455_v12 = vand.u32 4294901760, %v7525_v41 }
  0xfc   :  { %6512 = vmatpush3.bf16.msra.mxu1 %v7055_v43  ;;  %6477 = vmatprep.subr.bf16.mxu0 %v6938_v7  ;;  %v4932_v36 = vadd.f32 %v4931_v9, %v4930_v45  ;;  %v7413_v44 = vand.u32 4294901760, %v1870_v16  ;;  %v4929_v57 = vadd.f32 %v4928_v21, %v4927_v46  ;;  %v2967_v13 = vand.u32 4294901760, %v2966_v48 }
  0xfd   :  { %6513 = vmatprep.subr.bf16.mxu1 %v6938_v7  ;;  %5842 = vmatprep.mubr.msk.f32.mxu0 %vm6939_vm0, %v6940_v15  ;;  %v7424_v10 = vsel %vm332_vm6, %v4426_v50, %v4419_v19  ;;  %v2456_v14 = vsub.f32 %v7525_v41, %v2455_v12  ;;  %v7607_v28 = vand.u32 4294901760, %v3406_v23  ;;  %v7610_v47 = vand.u32 4294901760, %v3918_v27 }
  0xfe   :  { %5908 = vmatprep.mubr.msk.f32.mxu1 %vm6939_vm0, %v6940_v15  ;;  %v4933_v42 = vrot.slane %v4932_v36, 2  ;;  %v7430_v56 = vsub.f32 %v1870_v16, %v7413_v44  ;;  %v2968_v20 = vsub.f32 %v2966_v48, %v2967_v13  ;;  %v4430_v5 = vsel %vm315_vm1, %v7424_v10, 0 }
  0xff   :  { %6479 = vmatpush3.bf16.msra.mxu0 %v7060_v49  ;;  %v2457_v22 = vand.u32 4294901760, %v2456_v14  ;;  %v7618_v54 = vsub.f32 %v3406_v23, %v7607_v28  ;;  %v3990_v59 = vsub.f32 %v3918_v27, %v7610_v47  ;;  %v7700_v32 = vand.u32 4294901760, %v4430_v5 }
 0x100   :  { %6515 = vmatpush3.bf16.msra.mxu1 %v7060_v49  ;;  %6480 = vmatprep.subr.bf16.mxu0 %v6938_v7  ;;  %v4934_v53 = vadd.f32 %v4933_v42, %v4932_v36  ;;  %v1943_v63 = vand.u32 4294901760, %v7430_v56  ;;  %v2969_v52 = vand.u32 4294901760, %v2968_v20  ;;  %vm5465_vm15 = vcmask 64512  }
 0x101   :  { %6516 = vmatprep.subr.bf16.mxu1 %v6938_v7  ;;  %v3479_v30 = vand.u32 4294901760, %v7618_v54  ;;  %v3991_v45 = vand.u32 4294901760, %v3990_v59  ;;  %v7711_v35 = vsub.f32 %v4430_v5, %v7700_v32  ;;  %vm5467_vm2 = vcmask 97280  }
 0x102   :  { %5843 = vmatmul.mubr.f32.vlgmr.msra.gmra.mrb[0].mxu0 %v7242_v58  ;;  %v4935_v51 = vrot.slane %v4934_v53, 1  ;;  %v1944_v4 = vsub.f32 %v7430_v56, %v1943_v63  ;;  %vm5469_vm5 = vcmask 130048   ;;  %vm5473_vm3 = vcmask 195584  }
 0x103   :  { %6482 = vmatpush3.bf16.msra.mxu0 %v7035_v17  ;;  %5909 = vmatmul.mubr.f32.vlgmr.msra.gmra.mrb[0].mxu1 %v7245_v62  ;;  %v3480_v29 = vsub.f32 %v7618_v54, %v3479_v30  ;;  %v3992_v31 = vsub.f32 %v3990_v59, %v3991_v45  ;;  %v4503_v36 = vand.u32 4294901760, %v7711_v35  ;;  %vm5475_vm4 = vcmask 228352  }
 0x104   :  { %6518 = vmatpush3.bf16.msra.mxu1 %v7035_v17  ;;  %6483 = vmatprep.subr.bf16.mxu0 %v6938_v7  ;;  %v4936_v60 = vadd.f32 %v4935_v51, %v4934_v53  ;;  %vm5478_vm7 = vcmask 293888   ;;  %vm5480_vm9 = vcmask 320512  }
 0x105   :  { %6519 = vmatprep.subr.bf16.mxu1 %v6938_v7  ;;  %5853 = vmatprep.mubr.msk.f32.mxu0 %vm6939_vm0, %v6940_v15  ;;  %v3481_v3 = vand.u32 4294901760, %v3480_v29  ;;  %v3993_v9 = vand.u32 4294901760, %v3992_v31 }
 0x106   :  { %5919 = vmatprep.mubr.msk.f32.mxu1 %vm6939_vm0, %v6940_v15  ;;  %v7439_v1 = vsel %vm332_vm6, %v4936_v60, %v4929_v57  ;;  %vm5471_vm6 = vcmask 162816  }
 0x107   :  { %6485 = vmatpush3.bf16.msra.mxu0 %v7039_v18  ;;  %v4940_v16 = vsel %vm315_vm1, %v7439_v1, 0 }
 0x108   :  { %6521 = vmatpush3.bf16.msra.mxu1 %v7039_v18  ;;  %6522 = vmatprep.subr.bf16.mxu0 %v6938_v7  ;;  %v7703_v2 = vand.u32 4294901760, %v4940_v16 }
 0x109   :  { %6558 = vmatprep.subr.bf16.mxu1 %v6938_v7 }
 0x10a   :  { %5854 = vmatmul.mubr.f32.vlgmr.msra.gmra.mrb[0].mxu0 %v7242_v58  ;;  %v1433_v58 = vand.u32 4294901760, %v1432_v0  ;;  %v5012_v24 = vsub.f32 %v4940_v16, %v7703_v2 }
 0x10b   :  { %5920 = vmatmul.mubr.f32.vlgmr.msra.gmra.mrb[0].mxu1 %v7245_v62  ;;  %6524 = vmatpush3.bf16.msra.mxu0 %v7035_v17  ;;  %v1945_v62 = vand.u32 4294901760, %v1944_v4 }
 0x10c   :  { %6560 = vmatpush3.bf16.msra.mxu1 %v7035_v17  ;;  %6525 = vmatprep.subr.bf16.mxu0 %v6938_v7  ;;  %v5013_v39 = vand.u32 4294901760, %v5012_v24 }
 0x10d   :  { %6561 = vmatprep.subr.bf16.mxu1 %v6938_v7  ;;  %5930 = vmatprep.mubr.msk.f32.mxu0 %vm6939_vm0, %v6940_v15 }
 0x10e   :  { %5996 = vmatprep.mubr.msk.f32.mxu1 %vm6939_vm0, %v6940_v15  ;;  %v5014_v19 = vsub.f32 %v5012_v24, %v5013_v39 }
 0x10f   :  { %6527 = vmatpush3.bf16.msra.mxu0 %v7039_v18 }
 0x110   :  { %6563 = vmatpush3.bf16.msra.mxu1 %v7039_v18  ;;  %6528 = vmatprep.subr.bf16.mxu0 %v6938_v7  ;;  %v5015_v42 = vand.u32 4294901760, %v5014_v19 }
 0x111   :  { %6564 = vmatprep.subr.bf16.mxu1 %v6938_v7 }
 0x112   :  { %5931 = vmatmul.mubr.f32.vlgmr.msra.gmra.mrb[2].mxu0 %v1433_v58 }
 0x113   :  { %5997 = vmatmul.mubr.f32.vlgmr.msra.gmra.mrb[2].mxu1 %v1945_v62  ;;  %6530 = vmatpush3.bf16.msra.mxu0 %v7047_v33 }
 0x114   :  { %6566 = vmatpush3.bf16.msra.mxu1 %v7047_v33  ;;  %6531 = vmatprep.subr.bf16.mxu0 %v6938_v7 }
 0x115   :  { %6567 = vmatprep.subr.bf16.mxu1 %v6938_v7  ;;  %5941 = vmatprep.mubr.msk.f32.mxu0 %vm6939_vm0, %v6940_v15 }
 0x116   :  { %6007 = vmatprep.mubr.msk.f32.mxu1 %vm6939_vm0, %v6940_v15 }
 0x117   :  { %6533 = vmatpush3.bf16.msra.mxu0 %v7051_v37 }
 0x118   :  { %6569 = vmatpush3.bf16.msra.mxu1 %v7051_v37  ;;  %6534 = vmatprep.subr.bf16.mxu0 %v6938_v7 }
 0x119   :  { %6570 = vmatprep.subr.bf16.mxu1 %v6938_v7 }
 0x11a   :  { %5942 = vmatmul.mubr.f32.vlgmr.msra.gmra.mrb[2].mxu0 %v7410_v55 }
 0x11b   :  { %6008 = vmatmul.mubr.f32.vlgmr.msra.gmra.mrb[2].mxu1 %v7413_v44  ;;  %6536 = vmatpush3.bf16.msra.mxu0 %v7049_v34 }
 0x11c   :  { %6572 = vmatpush3.bf16.msra.mxu1 %v7049_v34  ;;  %6537 = vmatprep.subr.bf16.mxu0 %v6938_v7 }
 0x11d   :  { %6573 = vmatprep.subr.bf16.mxu1 %v6938_v7  ;;  %5952 = vmatprep.mubr.msk.f32.mxu0 %vm6939_vm0, %v6940_v15 }
 0x11e   :  { %6018 = vmatprep.mubr.msk.f32.mxu1 %vm6939_vm0, %v6940_v15 }
 0x11f   :  { %6539 = vmatpush3.bf16.msra.mxu0 %v7053_v38 }
 0x120   :  { %6575 = vmatpush3.bf16.msra.mxu1 %v7053_v38  ;;  %6540 = vmatprep.subr.bf16.mxu0 %v6938_v7 }
 0x121   :  { %6576 = vmatprep.subr.bf16.mxu1 %v6938_v7 }
 0x122   :  { %5953 = vmatmul.mubr.f32.vlgmr.msra.gmra.mrb[2].mxu0 %v7421_v26 }
 0x123   :  { %6019 = vmatmul.mubr.f32.vlgmr.msra.gmra.mrb[2].mxu1 %v7430_v56  ;;  %6542 = vmatpush3.bf16.msra.mxu0 %v7035_v17 }
 0x124   :  { %6578 = vmatpush3.bf16.msra.mxu1 %v7035_v17  ;;  %6543 = vmatprep.subr.bf16.mxu0 %v6938_v7 }
 0x125   :  { %6579 = vmatprep.subr.bf16.mxu1 %v6938_v7  ;;  %5963 = vmatprep.mubr.msk.f32.mxu0 %vm6939_vm0, %v6940_v15 }
 0x126   :  { %6029 = vmatprep.mubr.msk.f32.mxu1 %vm6939_vm0, %v6940_v15 }
 0x127   :  { %6545 = vmatpush3.bf16.msra.mxu0 %v7039_v18 }
 0x128   :  { %6581 = vmatpush3.bf16.msra.mxu1 %v7039_v18  ;;  %6546 = vmatprep.subr.bf16.mxu0 %v6938_v7 }
 0x129   :  { %6582 = vmatprep.subr.bf16.mxu1 %v6938_v7 }
 0x12a   :  { %5964 = vmatmul.mubr.f32.vlgmr.msra.gmra.mrb[2].mxu0 %v1431_v61 }
 0x12b   :  { %6030 = vmatmul.mubr.f32.vlgmr.msra.gmra.mrb[2].mxu1 %v1943_v63  ;;  %6548 = vmatpush3.bf16.msra.mxu0 %v7055_v43 }
 0x12c   :  { %6584 = vmatpush3.bf16.msra.mxu1 %v7055_v43  ;;  %6549 = vmatprep.subr.bf16.mxu0 %v6938_v7 }
 0x12d   :  { %6585 = vmatprep.subr.bf16.mxu1 %v6938_v7  ;;  %5974 = vmatprep.mubr.msk.f32.mxu0 %vm6939_vm0, %v6940_v15 }
 0x12e   :  { %6040 = vmatprep.mubr.msk.f32.mxu1 %vm6939_vm0, %v6940_v15 }
 0x12f   :  { %6551 = vmatpush3.bf16.msra.mxu0 %v7060_v49 }
 0x130   :  { %6587 = vmatpush3.bf16.msra.mxu1 %v7060_v49  ;;  %6552 = vmatprep.subr.bf16.mxu0 %v6938_v7 }
 0x131   :  { %6588 = vmatprep.subr.bf16.mxu1 %v6938_v7 }
 0x132   :  { %5975 = vmatmul.mubr.f32.vlgmr.msra.gmra.mrb[2].mxu0 %v7410_v55 }
 0x133   :  { %6041 = vmatmul.mubr.f32.vlgmr.msra.gmra.mrb[2].mxu1 %v7413_v44  ;;  %6554 = vmatpush3.bf16.msra.mxu0 %v7035_v17 }
 0x134   :  { %6590 = vmatpush3.bf16.msra.mxu1 %v7035_v17  ;;  %6555 = vmatprep.subr.bf16.mxu0 %v6938_v7 }
 0x135   :  { %6591 = vmatprep.subr.bf16.mxu1 %v6938_v7  ;;  %5985 = vmatprep.mubr.msk.f32.mxu0 %vm6939_vm0, %v6940_v15 }
 0x136   :  { %6051 = vmatprep.mubr.msk.f32.mxu1 %vm6939_vm0, %v6940_v15 }
 0x137   :  { %6557 = vmatpush3.bf16.msra.mxu0 %v7039_v18 }
 0x138   :  { %6593 = vmatpush3.bf16.msra.mxu1 %v7039_v18  ;;  %6594 = vmatprep.subr.bf16.mxu0 %v6938_v7 }
 0x139   :  { %6630 = vmatprep.subr.bf16.mxu1 %v6938_v7 }
 0x13a   :  { %5986 = vmatmul.mubr.f32.vlgmr.msra.gmra.mrb[2].mxu0 %v7410_v55  ;;  %v4504_v55 = vsub.f32 %v7711_v35, %v4503_v36 }
 0x13b   :  { %6052 = vmatmul.mubr.f32.vlgmr.msra.gmra.mrb[2].mxu1 %v7413_v44  ;;  %6596 = vmatpush3.bf16.msra.mxu0 %v7035_v17 }
 0x13c   :  { %6632 = vmatpush3.bf16.msra.mxu1 %v7035_v17  ;;  %6597 = vmatprep.subr.bf16.mxu0 %v6938_v7  ;;  %v4505_v40 = vand.u32 4294901760, %v4504_v55 }
 0x13d   :  { %6633 = vmatprep.subr.bf16.mxu1 %v6938_v7  ;;  %6062 = vmatprep.mubr.msk.f32.mxu0 %vm6939_vm0, %v6940_v15 }
 0x13e   :  { %6128 = vmatprep.mubr.msk.f32.mxu1 %vm6939_vm0, %v6940_v15 }
 0x13f   :  { %6599 = vmatpush3.bf16.msra.mxu0 %v7039_v18 }
 0x140   :  { %6635 = vmatpush3.bf16.msra.mxu1 %v7039_v18  ;;  %6600 = vmatprep.subr.bf16.mxu0 %v6938_v7 }
 0x141   :  { %6636 = vmatprep.subr.bf16.mxu1 %v6938_v7 }
 0x142   :  { %6063 = vmatmul.mubr.f32.vlgmr.msra.gmra.mrb[4].mxu0 %v2457_v22 }
 0x143   :  { %6129 = vmatmul.mubr.f32.vlgmr.msra.gmra.mrb[4].mxu1 %v2969_v52  ;;  %6602 = vmatpush3.bf16.msra.mxu0 %v7047_v33 }
 0x144   :  { %6638 = vmatpush3.bf16.msra.mxu1 %v7047_v33  ;;  %6603 = vmatprep.subr.bf16.mxu0 %v6938_v7 }
 0x145   :  { %6639 = vmatprep.subr.bf16.mxu1 %v6938_v7  ;;  %6073 = vmatprep.mubr.msk.f32.mxu0 %vm6939_vm0, %v6940_v15 }
 0x146   :  { %6139 = vmatprep.mubr.msk.f32.mxu1 %vm6939_vm0, %v6940_v15 }
 0x147   :  { %6605 = vmatpush3.bf16.msra.mxu0 %v7051_v37 }
 0x148   :  { %6641 = vmatpush3.bf16.msra.mxu1 %v7051_v37  ;;  %6606 = vmatprep.subr.bf16.mxu0 %v6938_v7 }
 0x149   :  { %6642 = vmatprep.subr.bf16.mxu1 %v6938_v7 }
 0x14a   :  { %6074 = vmatmul.mubr.f32.vlgmr.msra.gmra.mrb[4].mxu0 %v7514_v11 }
 0x14b   :  { %6140 = vmatmul.mubr.f32.vlgmr.msra.gmra.mrb[4].mxu1 %v7517_v8  ;;  %6608 = vmatpush3.bf16.msra.mxu0 %v7049_v34 }
 0x14c   :  { %6644 = vmatpush3.bf16.msra.mxu1 %v7049_v34  ;;  %6609 = vmatprep.subr.bf16.mxu0 %v6938_v7 }
 0x14d   :  { %6645 = vmatprep.subr.bf16.mxu1 %v6938_v7  ;;  %6084 = vmatprep.mubr.msk.f32.mxu0 %vm6939_vm0, %v6940_v15 }
 0x14e   :  { %6150 = vmatprep.mubr.msk.f32.mxu1 %vm6939_vm0, %v6940_v15 }
 0x14f   :  { %6611 = vmatpush3.bf16.msra.mxu0 %v7053_v38 }
 0x150   :  { %6647 = vmatpush3.bf16.msra.mxu1 %v7053_v38  ;;  %6612 = vmatprep.subr.bf16.mxu0 %v6938_v7 }
 0x151   :  { %6648 = vmatprep.subr.bf16.mxu1 %v6938_v7 }
 0x152   :  { %6085 = vmatmul.mubr.f32.vlgmr.msra.gmra.mrb[4].mxu0 %v7525_v41 }
 0x153   :  { %6151 = vmatmul.mubr.f32.vlgmr.msra.gmra.mrb[4].mxu1 %v2966_v48  ;;  %6614 = vmatpush3.bf16.msra.mxu0 %v7035_v17 }
 0x154   :  { %6650 = vmatpush3.bf16.msra.mxu1 %v7035_v17  ;;  %6615 = vmatprep.subr.bf16.mxu0 %v6938_v7 }
 0x155   :  { %6651 = vmatprep.subr.bf16.mxu1 %v6938_v7  ;;  %6095 = vmatprep.mubr.msk.f32.mxu0 %vm6939_vm0, %v6940_v15 }
 0x156   :  { %6161 = vmatprep.mubr.msk.f32.mxu1 %vm6939_vm0, %v6940_v15 }
 0x157   :  { %6617 = vmatpush3.bf16.msra.mxu0 %v7039_v18 }
 0x158   :  { %6653 = vmatpush3.bf16.msra.mxu1 %v7039_v18  ;;  %6618 = vmatprep.subr.bf16.mxu0 %v6938_v7 }
 0x159   :  { %6654 = vmatprep.subr.bf16.mxu1 %v6938_v7 }
 0x15a   :  { %6096 = vmatmul.mubr.f32.vlgmr.msra.gmra.mrb[4].mxu0 %v2455_v12 }
 0x15b   :  { %6162 = vmatmul.mubr.f32.vlgmr.msra.gmra.mrb[4].mxu1 %v2967_v13  ;;  %6620 = vmatpush3.bf16.msra.mxu0 %v7055_v43 }
 0x15c   :  { %6656 = vmatpush3.bf16.msra.mxu1 %v7055_v43  ;;  %6621 = vmatprep.subr.bf16.mxu0 %v6938_v7 }
 0x15d   :  { %6657 = vmatprep.subr.bf16.mxu1 %v6938_v7  ;;  %6106 = vmatprep.mubr.msk.f32.mxu0 %vm6939_vm0, %v6940_v15 }
 0x15e   :  { %6172 = vmatprep.mubr.msk.f32.mxu1 %vm6939_vm0, %v6940_v15 }
 0x15f   :  { %6623 = vmatpush3.bf16.msra.mxu0 %v7060_v49 }
 0x160   :  { %6659 = vmatpush3.bf16.msra.mxu1 %v7060_v49  ;;  %6624 = vmatprep.subr.bf16.mxu0 %v6938_v7 }
 0x161   :  { %6660 = vmatprep.subr.bf16.mxu1 %v6938_v7 }
 0x162   :  { %6107 = vmatmul.mubr.f32.vlgmr.msra.gmra.mrb[4].mxu0 %v7514_v11 }
 0x163   :  { %6173 = vmatmul.mubr.f32.vlgmr.msra.gmra.mrb[4].mxu1 %v7517_v8  ;;  %6626 = vmatpush3.bf16.msra.mxu0 %v7035_v17 }
 0x164   :  { %6662 = vmatpush3.bf16.msra.mxu1 %v7035_v17  ;;  %6627 = vmatprep.subr.bf16.mxu0 %v6938_v7 }
 0x165   :  { %6663 = vmatprep.subr.bf16.mxu1 %v6938_v7  ;;  %6117 = vmatprep.mubr.msk.f32.mxu0 %vm6939_vm0, %v6940_v15 }
 0x166   :  { %6183 = vmatprep.mubr.msk.f32.mxu1 %vm6939_vm0, %v6940_v15 }
 0x167   :  { %6629 = vmatpush3.bf16.msra.mxu0 %v7039_v18 }
 0x168   :  { %6665 = vmatpush3.bf16.msra.mxu1 %v7039_v18  ;;  %6666 = vmatprep.subr.bf16.mxu0 %v6938_v7 }
 0x169   :  { %6702 = vmatprep.subr.bf16.mxu1 %v6938_v7 }
 0x16a   :  { %6118 = vmatmul.mubr.f32.vlgmr.msra.gmra.mrb[4].mxu0 %v7514_v11 }
 0x16b   :  { %6184 = vmatmul.mubr.f32.vlgmr.msra.gmra.mrb[4].mxu1 %v7517_v8  ;;  %6668 = vmatpush3.bf16.msra.mxu0 %v7035_v17 }
 0x16c   :  { %6704 = vmatpush3.bf16.msra.mxu1 %v7035_v17  ;;  %6669 = vmatprep.subr.bf16.mxu0 %v6938_v7 }
 0x16d   :  { %6705 = vmatprep.subr.bf16.mxu1 %v6938_v7  ;;  %6194 = vmatprep.mubr.msk.f32.mxu0 %vm6939_vm0, %v6940_v15 }
 0x16e   :  { %6260 = vmatprep.mubr.msk.f32.mxu1 %vm6939_vm0, %v6940_v15 }
 0x16f   :  { %6671 = vmatpush3.bf16.msra.mxu0 %v7039_v18 }
 0x170   :  { %6707 = vmatpush3.bf16.msra.mxu1 %v7039_v18  ;;  %6672 = vmatprep.subr.bf16.mxu0 %v6938_v7 }
 0x171   :  { %6708 = vmatprep.subr.bf16.mxu1 %v6938_v7 }
 0x172   :  { %6195 = vmatmul.mubr.f32.vlgmr.msra.gmra.mrb[6].mxu0 %v3481_v3 }
 0x173   :  { %6261 = vmatmul.mubr.f32.vlgmr.msra.gmra.mrb[6].mxu1 %v3993_v9  ;;  %6674 = vmatpush3.bf16.msra.mxu0 %v7047_v33 }
 0x174   :  { %6710 = vmatpush3.bf16.msra.mxu1 %v7047_v33  ;;  %6675 = vmatprep.subr.bf16.mxu0 %v6938_v7 }
 0x175   :  { %6711 = vmatprep.subr.bf16.mxu1 %v6938_v7  ;;  %6205 = vmatprep.mubr.msk.f32.mxu0 %vm6939_vm0, %v6940_v15 }
 0x176   :  { %6271 = vmatprep.mubr.msk.f32.mxu1 %vm6939_vm0, %v6940_v15 }
 0x177   :  { %6677 = vmatpush3.bf16.msra.mxu0 %v7051_v37 }
 0x178   :  { %6713 = vmatpush3.bf16.msra.mxu1 %v7051_v37  ;;  %6678 = vmatprep.subr.bf16.mxu0 %v6938_v7 }
 0x179   :  { %6714 = vmatprep.subr.bf16.mxu1 %v6938_v7 }
 0x17a   :  { %6206 = vmatmul.mubr.f32.vlgmr.msra.gmra.mrb[6].mxu0 %v7607_v28 }
 0x17b   :  { %6272 = vmatmul.mubr.f32.vlgmr.msra.gmra.mrb[6].mxu1 %v7610_v47  ;;  %6680 = vmatpush3.bf16.msra.mxu0 %v7049_v34 }
 0x17c   :  { %6716 = vmatpush3.bf16.msra.mxu1 %v7049_v34  ;;  %6681 = vmatprep.subr.bf16.mxu0 %v6938_v7 }
 0x17d   :  { %6717 = vmatprep.subr.bf16.mxu1 %v6938_v7  ;;  %6216 = vmatprep.mubr.msk.f32.mxu0 %vm6939_vm0, %v6940_v15 }
 0x17e   :  { %6282 = vmatprep.mubr.msk.f32.mxu1 %vm6939_vm0, %v6940_v15 }
 0x17f   :  { %6683 = vmatpush3.bf16.msra.mxu0 %v7053_v38 }
 0x180   :  { %6719 = vmatpush3.bf16.msra.mxu1 %v7053_v38  ;;  %6684 = vmatprep.subr.bf16.mxu0 %v6938_v7 }
 0x181   :  { %6720 = vmatprep.subr.bf16.mxu1 %v6938_v7 }
 0x182   :  { %6217 = vmatmul.mubr.f32.vlgmr.msra.gmra.mrb[6].mxu0 %v7618_v54 }
 0x183   :  { %6283 = vmatmul.mubr.f32.vlgmr.msra.gmra.mrb[6].mxu1 %v3990_v59  ;;  %6686 = vmatpush3.bf16.msra.mxu0 %v7035_v17 }
 0x184   :  { %6722 = vmatpush3.bf16.msra.mxu1 %v7035_v17  ;;  %6687 = vmatprep.subr.bf16.mxu0 %v6938_v7 }
 0x185   :  { %6723 = vmatprep.subr.bf16.mxu1 %v6938_v7  ;;  %6227 = vmatprep.mubr.msk.f32.mxu0 %vm6939_vm0, %v6940_v15 }
 0x186   :  { %6293 = vmatprep.mubr.msk.f32.mxu1 %vm6939_vm0, %v6940_v15 }
 0x187   :  { %6689 = vmatpush3.bf16.msra.mxu0 %v7039_v18 }
 0x188   :  { %6725 = vmatpush3.bf16.msra.mxu1 %v7039_v18  ;;  %6690 = vmatprep.subr.bf16.mxu0 %v6938_v7 }
 0x189   :  { %6726 = vmatprep.subr.bf16.mxu1 %v6938_v7 }
 0x18a   :  { %6228 = vmatmul.mubr.f32.vlgmr.msra.gmra.mrb[6].mxu0 %v3479_v30 }
 0x18b   :  { %6294 = vmatmul.mubr.f32.vlgmr.msra.gmra.mrb[6].mxu1 %v3991_v45  ;;  %6692 = vmatpush3.bf16.msra.mxu0 %v7055_v43 }
 0x18c   :  { %6728 = vmatpush3.bf16.msra.mxu1 %v7055_v43  ;;  %6693 = vmatprep.subr.bf16.mxu0 %v6938_v7 }
 0x18d   :  { %6729 = vmatprep.subr.bf16.mxu1 %v6938_v7  ;;  %6238 = vmatprep.mubr.msk.f32.mxu0 %vm6939_vm0, %v6940_v15 }
 0x18e   :  { %6304 = vmatprep.mubr.msk.f32.mxu1 %vm6939_vm0, %v6940_v15 }
 0x18f   :  { %6695 = vmatpush3.bf16.msra.mxu0 %v7060_v49 }
 0x190   :  { %6731 = vmatpush3.bf16.msra.mxu1 %v7060_v49  ;;  %6696 = vmatprep.subr.bf16.mxu0 %v6938_v7 }
 0x191   :  { %6732 = vmatprep.subr.bf16.mxu1 %v6938_v7 }
 0x192   :  { %6239 = vmatmul.mubr.f32.vlgmr.msra.gmra.mrb[6].mxu0 %v7607_v28 }
 0x193   :  { %6305 = vmatmul.mubr.f32.vlgmr.msra.gmra.mrb[6].mxu1 %v7610_v47  ;;  %6698 = vmatpush3.bf16.msra.mxu0 %v7035_v17 }
 0x194   :  { %6734 = vmatpush3.bf16.msra.mxu1 %v7035_v17  ;;  %6699 = vmatprep.subr.bf16.mxu0 %v6938_v7 }
 0x195   :  { %6735 = vmatprep.subr.bf16.mxu1 %v6938_v7  ;;  %6249 = vmatprep.mubr.msk.f32.mxu0 %vm6939_vm0, %v6940_v15 }
 0x196   :  { %6315 = vmatprep.mubr.msk.f32.mxu1 %vm6939_vm0, %v6940_v15 }
 0x197   :  { %6701 = vmatpush3.bf16.msra.mxu0 %v7039_v18 }
 0x198   :  { %6737 = vmatpush3.bf16.msra.mxu1 %v7039_v18  ;;  %6738 = vmatprep.subr.bf16.mxu0 %v6938_v7 }
 0x199   :  { %6774 = vmatprep.subr.bf16.mxu1 %v6938_v7 }
 0x19a   :  { %6250 = vmatmul.mubr.f32.vlgmr.msra.gmra.mrb[6].mxu0 %v7607_v28 }
 0x19b   :  { %6316 = vmatmul.mubr.f32.vlgmr.msra.gmra.mrb[6].mxu1 %v7610_v47  ;;  %6740 = vmatpush3.bf16.msra.mxu0 %v7035_v17 }
 0x19c   :  { %6776 = vmatpush3.bf16.msra.mxu1 %v7035_v17  ;;  %6741 = vmatprep.subr.bf16.mxu0 %v6938_v7 }
 0x19d   :  { %6777 = vmatprep.subr.bf16.mxu1 %v6938_v7  ;;  %6326 = vmatprep.mubr.msk.f32.mxu0 %vm6939_vm0, %v6940_v15 }
 0x19e   :  { %6392 = vmatprep.mubr.msk.f32.mxu1 %vm6939_vm0, %v6940_v15 }
 0x19f   :  { %6743 = vmatpush3.bf16.msra.mxu0 %v7039_v18 }
 0x1a0   :  { %6779 = vmatpush3.bf16.msra.mxu1 %v7039_v18  ;;  %6744 = vmatprep.subr.bf16.mxu0 %v6938_v7 }
 0x1a1   :  { %6780 = vmatprep.subr.bf16.mxu1 %v6938_v7 }
 0x1a2   :  { %6327 = vmatmul.mubr.f32.vlgmr.msra.gmra.mrb[8].mxu0 %v4505_v40 }
 0x1a3   :  { %6393 = vmatmul.mubr.f32.vlgmr.msra.gmra.mrb[8].mxu1 %v5015_v42  ;;  %6746 = vmatpush3.bf16.msra.mxu0 %v7047_v33 }
 0x1a4   :  { %6782 = vmatpush3.bf16.msra.mxu1 %v7047_v33  ;;  %6747 = vmatprep.subr.bf16.mxu0 %v6938_v7 }
 0x1a5   :  { %6783 = vmatprep.subr.bf16.mxu1 %v6938_v7  ;;  %6337 = vmatprep.mubr.msk.f32.mxu0 %vm6939_vm0, %v6940_v15 }
 0x1a6   :  { %6403 = vmatprep.mubr.msk.f32.mxu1 %vm6939_vm0, %v6940_v15 }
 0x1a7   :  { %6749 = vmatpush3.bf16.msra.mxu0 %v7051_v37 }
 0x1a8   :  { %6785 = vmatpush3.bf16.msra.mxu1 %v7051_v37  ;;  %6750 = vmatprep.subr.bf16.mxu0 %v6938_v7 }
 0x1a9   :  { %6786 = vmatprep.subr.bf16.mxu1 %v6938_v7 }
 0x1aa   :  { %6338 = vmatmul.mubr.f32.vlgmr.msra.gmra.mrb[8].mxu0 %v7700_v32 }
 0x1ab   :  { %6404 = vmatmul.mubr.f32.vlgmr.msra.gmra.mrb[8].mxu1 %v7703_v2  ;;  %6752 = vmatpush3.bf16.msra.mxu0 %v7049_v34 }
 0x1ac   :  { %6788 = vmatpush3.bf16.msra.mxu1 %v7049_v34  ;;  %6753 = vmatprep.subr.bf16.mxu0 %v6938_v7 }
 0x1ad   :  { %6789 = vmatprep.subr.bf16.mxu1 %v6938_v7  ;;  %6348 = vmatprep.mubr.msk.f32.mxu0 %vm6939_vm0, %v6940_v15 }
 0x1ae   :  { %6414 = vmatprep.mubr.msk.f32.mxu1 %vm6939_vm0, %v6940_v15 }
 0x1af   :  { %6755 = vmatpush3.bf16.msra.mxu0 %v7053_v38 }
 0x1b0   :  { %6791 = vmatpush3.bf16.msra.mxu1 %v7053_v38  ;;  %6756 = vmatprep.subr.bf16.mxu0 %v6938_v7 }
 0x1b1   :  { %6792 = vmatprep.subr.bf16.mxu1 %v6938_v7 }
 0x1b2   :  { %6349 = vmatmul.mubr.f32.vlgmr.msra.gmra.mrb[8].mxu0 %v7711_v35 }
 0x1b3   :  { %6415 = vmatmul.mubr.f32.vlgmr.msra.gmra.mrb[8].mxu1 %v5012_v24  ;;  %6758 = vmatpush3.bf16.msra.mxu0 %v7035_v17 }
 0x1b4   :  { %6794 = vmatpush3.bf16.msra.mxu1 %v7035_v17  ;;  %6759 = vmatprep.subr.bf16.mxu0 %v6938_v7 }
 0x1b5   :  { %6795 = vmatprep.subr.bf16.mxu1 %v6938_v7  ;;  %6359 = vmatprep.mubr.msk.f32.mxu0 %vm6939_vm0, %v6940_v15 }
 0x1b6   :  { %6425 = vmatprep.mubr.msk.f32.mxu1 %vm6939_vm0, %v6940_v15 }
 0x1b7   :  { %6761 = vmatpush3.bf16.msra.mxu0 %v7039_v18 }
 0x1b8   :  { %6797 = vmatpush3.bf16.msra.mxu1 %v7039_v18  ;;  %6762 = vmatprep.subr.bf16.mxu0 %v6938_v7 }
 0x1b9   :  { %6798 = vmatprep.subr.bf16.mxu1 %v6938_v7 }
 0x1ba   :  { %6360 = vmatmul.mubr.f32.vlgmr.msra.gmra.mrb[8].mxu0 %v4503_v36 }
 0x1bb   :  { %6426 = vmatmul.mubr.f32.vlgmr.msra.gmra.mrb[8].mxu1 %v5013_v39  ;;  %6764 = vmatpush3.bf16.msra.mxu0 %v7055_v43 }
 0x1bc   :  { %6800 = vmatpush3.bf16.msra.mxu1 %v7055_v43  ;;  %6765 = vmatprep.subr.bf16.mxu0 %v6938_v7 }
 0x1bd   :  { %6801 = vmatprep.subr.bf16.mxu1 %v6938_v7  ;;  %6370 = vmatprep.mubr.msk.f32.mxu0 %vm6939_vm0, %v6940_v15 }
 0x1be   :  { %6436 = vmatprep.mubr.msk.f32.mxu1 %vm6939_vm0, %v6940_v15 }
 0x1bf   :  { %6767 = vmatpush3.bf16.msra.mxu0 %v7060_v49 }
 0x1c0   :  { %6803 = vmatpush3.bf16.msra.mxu1 %v7060_v49  ;;  %6768 = vmatprep.subr.bf16.mxu0 %v6938_v7 }
 0x1c1   :  { %6804 = vmatprep.subr.bf16.mxu1 %v6938_v7 }
 0x1c2   :  { %6371 = vmatmul.mubr.f32.vlgmr.msra.gmra.mrb[8].mxu0 %v7700_v32 }
 0x1c3   :  { %6437 = vmatmul.mubr.f32.vlgmr.msra.gmra.mrb[8].mxu1 %v7703_v2  ;;  %6770 = vmatpush3.bf16.msra.mxu0 %v7035_v17 }
 0x1c4   :  { %6806 = vmatpush3.bf16.msra.mxu1 %v7035_v17  ;;  %6771 = vmatprep.subr.bf16.mxu0 %v6938_v7 }
 0x1c5   :  { %6807 = vmatprep.subr.bf16.mxu1 %v6938_v7  ;;  %6381 = vmatprep.mubr.msk.f32.mxu0 %vm6939_vm0, %v6940_v15 }
 0x1c6   :  { %6447 = vmatprep.mubr.msk.f32.mxu1 %vm6939_vm0, %v6940_v15  ;;  %vm5463_vm0 = vcmask 31744  }
 0x1c7   :  { %6773 = vmatpush3.bf16.msra.mxu0 %v7039_v18 }
 0x1c8   :  { %6809 = vmatpush3.bf16.msra.mxu1 %v7039_v18 }
 0x1ca   :  { %6382 = vmatmul.mubr.f32.vlgmr.msra.gmra.mrb[8].mxu0 %v7700_v32 }
 0x1cb   :  { %6448 = vmatmul.mubr.f32.vlgmr.msra.gmra.mrb[8].mxu1 %v7703_v2 }
 0x1dd   :  { %v817_v33 = vpop.f32.mrb[0].mxu0 }
 0x1de   :  { %v1329_v17 = vpop.f32.mrb[0].mxu1  ;;  %v5855_v34 = vpop.f32.mrb[1].mxu0 }
 0x1df   :  { %5428 = vrot.lane.b32.xlu1 %v1329_v17, %s6941_s2  ;;  %v5921_v7 = vpop.f32.mrb[1].mxu1 }
 0x20d   :  { %v1841_v37 = vpop.f32.mrb[2].mxu0 }
 0x20e   :  { %v2353_v38 = vpop.f32.mrb[2].mxu1  ;;  %5432 = vrot.lane.b32.xlu0 %v1841_v37, %s6942_s3  ;;  %v5987_v43 = vpop.f32.mrb[3].mxu0 }
 0x20f   :  { %5436 = vrot.lane.b32.xlu1 %v2353_v38, %s6943_s21  ;;  %v6053_v15 = vpop.f32.mrb[3].mxu1 }
 0x23d   :  { %v2865_v49 = vpop.f32.mrb[4].mxu0 }
 0x23e   :  { %v3377_v18 = vpop.f32.mrb[4].mxu1  ;;  %5440 = vrot.lane.b32.xlu0 %v2865_v49, %s6944_s22  ;;  %v6119_v44 = vpop.f32.mrb[5].mxu0 }
 0x23f   :  { %5444 = vrot.lane.b32.xlu1 %v3377_v18, %s6945_s23  ;;  %v6185_v46 = vpop.f32.mrb[5].mxu1 }
 0x251   :  { %v5429_v60 = vpop.permute.xlu1 %5428 }
 0x252   :  { %v5464_v1 = vsel %vm5463_vm0, %v817_v33, %v5429_v60 }
 0x26d   :  { %v3889_v50 = vpop.f32.mrb[6].mxu0 }
 0x26e   :  { %v4401_v53 = vpop.f32.mrb[6].mxu1  ;;  %5448 = vrot.lane.b32.xlu0 %v3889_v50, %s6946_s24  ;;  %v6251_v21 = vpop.f32.mrb[7].mxu0 }
 0x26f   :  { %5452 = vrot.lane.b32.xlu1 %v4401_v53, %s6947_s25  ;;  %v6317_v26 = vpop.f32.mrb[7].mxu1 }
 0x280   :  { %v5433_v61 = vpop.permute.xlu0 %5432 }
 0x281   :  { %v5437_v63 = vpop.permute.xlu1 %5436  ;;  %v5466_v0 = vsel %vm5465_vm15, %v5464_v1, %v5433_v61 }
 0x282   :  { %v5468_v58 = vsel %vm5467_vm2, %v5466_v0, %v5437_v63 }
 0x29d   :  { %v4913_v10 = vpop.f32.mrb[8].mxu0 }
 0x29e   :  { %v5423_v51 = vpop.f32.mrb[8].mxu1  ;;  %5456 = vrot.lane.b32.xlu0 %v4913_v10, %s6948_s26  ;;  %v6383_v56 = vpop.f32.mrb[9].mxu0 }
 0x29f   :  { %5460 = vrot.lane.b32.xlu1 %v5423_v51, %s6949_s27  ;;  %v6449_v57 = vpop.f32.mrb[9].mxu1 }
 0x2b0   :  { %v5441_v4 = vpop.permute.xlu0 %5440 }
 0x2b1   :  { %v5445_v62 = vpop.permute.xlu1 %5444  ;;  %v5470_v6 = vsel %vm5469_vm5, %v5468_v58, %v5441_v4 }
 0x2b2   :  { %v5472_v11 = vsel %vm5471_vm6, %v5470_v6, %v5445_v62 }
 0x2e0   :  { %v5449_v25 = vpop.permute.xlu0 %5448 }
 0x2e1   :  { %v5453_v8 = vpop.permute.xlu1 %5452  ;;  %v5474_v41 = vsel %vm5473_vm3, %v5472_v11, %v5449_v25 }
 0x2e2   :  { %v5476_v48 = vsel %vm5475_vm4, %v5474_v41, %v5453_v8 }
 0x310   :  { %v5457_v12 = vpop.permute.xlu0 %5456 }
 0x311   :  { %v5461_v13 = vpop.permute.xlu1 %5460  ;;  %v5477_v14 = vsel %vm315_vm1, %v5476_v48, %v5457_v12 }
 0x312   :  { %v5479_v20 = vsel %vm5478_vm7, %v5477_v14, %v5461_v13 }
 0x313   :  { %5481 = vst.msk [vmem:[%s7814_s6] sm:$0x3] %vm5480_vm9, %v5479_v20 }

</bundles_post_ra>
